<compile_context>
chip_gen: v5e
topology: v5e:2x2
jax: 0.10.0
libtpu: 0.0.40
codegen_flags: <defaults>
</compile_context>

<pallas_src>
import functools

import jax
import jax.numpy as jnp
from jax import lax
from jax.experimental import pallas as pl
from jax.experimental.pallas import tpu as pltpu

K = 7
PAD = K // 2


def _sa_kernel(w_ref, x_ref, o_ref, pad_ref, *, C, H, W):
    x = x_ref[0]                                   # (C, H, W), input dtype
    xf = x.astype(jnp.float32)

    # Channel reductions (reduce over the leading axis -> pure VPU adds/maxes
    # over the (H, W) sublane/lane tile, no cross-lane work).
    avg = jnp.mean(xf, axis=0)                     # (H, W) f32
    mx = jnp.max(xf, axis=0)                       # (H, W) f32

    # Zero-padded conv input in VMEM scratch: (2, H+2*PAD, W+2*PAD).
    pad_ref[...] = jnp.zeros_like(pad_ref)
    pad_ref[0, PAD:PAD + H, PAD:PAD + W] = avg
    pad_ref[1, PAD:PAD + H, PAD:PAD + W] = mx

    # 7x7, 2->1 conv as 98 shifted scalar*tile FMAs over static slices.
    acc = jnp.zeros((H, W), jnp.float32)
    for c in range(2):
        for dy in range(K):
            for dx in range(K):
                wgt = w_ref[c * K * K + dy * K + dx]          # scalar from SMEM
                acc = acc + wgt * pad_ref[c, dy:dy + H, dx:dx + W]

    attn = 1.0 / (1.0 + jnp.exp(-acc))             # sigmoid (EUP exp + recip)
    o_ref[0] = x * attn[None, :, :].astype(x.dtype)


def sa_forward(x, conv_weight):
    """JAX/Pallas equivalent of SA.forward.  conv_weight: (1, 2, 7, 7), no bias."""
    N, C, H, W = x.shape
    assert conv_weight.shape == (1, 2, K, K)

    # Flat 1-D f32 weight table in SMEM (1-D avoids the 2-D SMEM padding blowup).
    w_flat = conv_weight.astype(jnp.float32).reshape(2 * K * K)

    kernel = functools.partial(_sa_kernel, C=C, H=H, W=W)

    return pl.pallas_call(
        kernel,
        out_shape=jax.ShapeDtypeStruct(x.shape, x.dtype),
        grid=(N,),
        in_specs=[
            pl.BlockSpec(memory_space=pltpu.MemorySpace.SMEM),       # conv weights
            pl.BlockSpec((1, C, H, W), lambda n: (n, 0, 0, 0)),      # one sample of x
        ],
        out_specs=pl.BlockSpec((1, C, H, W), lambda n: (n, 0, 0, 0)),
        scratch_shapes=[pltpu.VMEM((2, H + 2 * PAD, W + 2 * PAD), jnp.float32)],
        compiler_params=pltpu.CompilerParams(
            dimension_semantics=("parallel",),      # shard batch across TCs (v7x)
        ),
    )(w_flat, x)


def _sa_reference(x, w):
    avg = jnp.mean(x, axis=1, keepdims=True)
    mx = jnp.max(x, axis=1, keepdims=True)
    cat = jnp.concatenate([avg, mx], axis=1)
    net = lax.conv_general_dilated(
        cat, w, window_strides=(1, 1),
        padding=((PAD, PAD), (PAD, PAD)),
        dimension_numbers=("NCHW", "OIHW", "NCHW"))
    return jax.nn.sigmoid(net) * x


if __name__ == "__main__":
    key = jax.random.PRNGKey(0)
    kx, kw = jax.random.split(key)
    x = jax.random.normal(kx, (2, 4, 16, 16), dtype=jnp.float32)
    w = jax.random.normal(kw, (1, 2, K, K), dtype=jnp.float32) * 0.1

    y = sa_forward(x, w)
    jax.block_until_ready(y)
    assert y.shape == x.shape and y.dtype == x.dtype

    y_ref = _sa_reference(x, w)
    assert jnp.allclose(y, y_ref, rtol=1e-3, atol=1e-3), float(
        jnp.max(jnp.abs(y - y_ref)))

    print("KERNEL_OK")
</pallas_src>

<mosaic_0001>
module attributes {stable_mosaic.version = 11 : i64} {
  func.func @_sa_kernel(%arg0: i32, %arg1: memref<98xf32, #tpu.memory_space<smem>>, %arg2: memref<1x4x16x16xf32, #tpu.memory_space<vmem>>, %arg3: memref<1x4x16x16xf32, #tpu.memory_space<vmem>>, %arg4: memref<2x22x22xf32, #tpu.memory_space<vmem>>) attributes {dimension_semantics = [#tpu.dimension_semantics<parallel>], iteration_bounds = array<i64: 2>, scalar_prefetch = 0 : i64, scratch_operands = 1 : i64, tpu.core_type = #tpu.core_type<tc>, window_params = [{transform_indices = @transform_0, window_bounds = array<i64: 98>}, {transform_indices = @transform_1, window_bounds = array<i64: 1, 4, 16, 16>}, {transform_indices = @transform_2, window_bounds = array<i64: 1, 4, 16, 16>}]} {
    %c0 = arith.constant 0 : index
    %c0_0 = arith.constant 0 : index
    %c0_1 = arith.constant 0 : index
    %c0_2 = arith.constant 0 : index
    %0 = vector.load %arg2[%c0, %c0_0, %c0_1, %c0_2] : memref<1x4x16x16xf32, #tpu.memory_space<vmem>>, vector<1x4x16x16xf32>
    %1 = vector.shape_cast %0 : vector<1x4x16x16xf32> to vector<4x16x16xf32>
    %cst = arith.constant dense<0.000000e+00> : vector<16x16xf32>
    %2 = vector.multi_reduction <add>, %1, %cst [0] : vector<4x16x16xf32> to vector<16x16xf32>
    %cst_3 = arith.constant 4.000000e+00 : f32
    %3 = vector.broadcast %cst_3 : f32 to vector<16x16xf32>
    %4 = arith.divf %2, %3 : vector<16x16xf32>
    %cst_4 = arith.constant dense<0xFF800000> : vector<16x16xf32>
    %5 = vector.multi_reduction <maximumf>, %1, %cst_4 [0] : vector<4x16x16xf32> to vector<16x16xf32>
    %cst_5 = arith.constant 0.000000e+00 : f32
    %6 = vector.broadcast %cst_5 : f32 to vector<2x22x22xf32>
    %c0_6 = arith.constant 0 : index
    %c0_7 = arith.constant 0 : index
    %c0_8 = arith.constant 0 : index
    %7 = vector.load %arg4[%c0_6, %c0_7, %c0_8] : memref<2x22x22xf32, #tpu.memory_space<vmem>>, vector<2x22x22xf32>
    tpu.vector_store %arg4[%c0_6, %c0_7, %c0_8], %6 {strides = array<i32>} : memref<2x22x22xf32, #tpu.memory_space<vmem>>, vector<2x22x22xf32>,
    %c0_9 = arith.constant 0 : index
    %c3 = arith.constant 3 : index
    %c3_10 = arith.constant 3 : index
    %8 = vector.load %arg4[%c0_9, %c3, %c3_10] : memref<2x22x22xf32, #tpu.memory_space<vmem>>, vector<1x16x16xf32>
    %9 = vector.shape_cast %8 : vector<1x16x16xf32> to vector<16x16xf32>
    %10 = vector.shape_cast %4 : vector<16x16xf32> to vector<1x16x16xf32>
    tpu.vector_store %arg4[%c0_9, %c3, %c3_10], %10 {strides = array<i32>} : memref<2x22x22xf32, #tpu.memory_space<vmem>>, vector<1x16x16xf32>,
    %c1 = arith.constant 1 : index
    %c3_11 = arith.constant 3 : index
    %c3_12 = arith.constant 3 : index
    %11 = vector.load %arg4[%c1, %c3_11, %c3_12] : memref<2x22x22xf32, #tpu.memory_space<vmem>>, vector<1x16x16xf32>
    %12 = vector.shape_cast %11 : vector<1x16x16xf32> to vector<16x16xf32>
    %13 = vector.shape_cast %5 : vector<16x16xf32> to vector<1x16x16xf32>
    tpu.vector_store %arg4[%c1, %c3_11, %c3_12], %13 {strides = array<i32>} : memref<2x22x22xf32, #tpu.memory_space<vmem>>, vector<1x16x16xf32>,
    %cst_13 = arith.constant 0.000000e+00 : f32
    %14 = vector.broadcast %cst_13 : f32 to vector<16x16xf32>
    %c0_14 = arith.constant 0 : index
    %15 = memref.load %arg1[%c0_14] : memref<98xf32, #tpu.memory_space<smem>>
    %c0_15 = arith.constant 0 : index
    %c0_16 = arith.constant 0 : index
    %c0_17 = arith.constant 0 : index
    %16 = vector.load %arg4[%c0_15, %c0_16, %c0_17] : memref<2x22x22xf32, #tpu.memory_space<vmem>>, vector<1x16x16xf32>
    %17 = vector.shape_cast %16 : vector<1x16x16xf32> to vector<16x16xf32>
    %18 = vector.broadcast %15 : f32 to vector<16x16xf32>
    %19 = arith.mulf %18, %17 : vector<16x16xf32>
    %20 = arith.addf %14, %19 : vector<16x16xf32>
    %c1_18 = arith.constant 1 : index
    %21 = memref.load %arg1[%c1_18] : memref<98xf32, #tpu.memory_space<smem>>
    %c0_19 = arith.constant 0 : index
    %c0_20 = arith.constant 0 : index
    %c1_21 = arith.constant 1 : index
    %22 = vector.load %arg4[%c0_19, %c0_20, %c1_21] : memref<2x22x22xf32, #tpu.memory_space<vmem>>, vector<1x16x16xf32>
    %23 = vector.shape_cast %22 : vector<1x16x16xf32> to vector<16x16xf32>
    %24 = vector.broadcast %21 : f32 to vector<16x16xf32>
    %25 = arith.mulf %24, %23 : vector<16x16xf32>
    %26 = arith.addf %20, %25 : vector<16x16xf32>
    %c2 = arith.constant 2 : index
    %27 = memref.load %arg1[%c2] : memref<98xf32, #tpu.memory_space<smem>>
    %c0_22 = arith.constant 0 : index
    %c0_23 = arith.constant 0 : index
    %c2_24 = arith.constant 2 : index
    %28 = vector.load %arg4[%c0_22, %c0_23, %c2_24] : memref<2x22x22xf32, #tpu.memory_space<vmem>>, vector<1x16x16xf32>
    %29 = vector.shape_cast %28 : vector<1x16x16xf32> to vector<16x16xf32>
    %30 = vector.broadcast %27 : f32 to vector<16x16xf32>
    %31 = arith.mulf %30, %29 : vector<16x16xf32>
    %32 = arith.addf %26, %31 : vector<16x16xf32>
    %c3_25 = arith.constant 3 : index
    %33 = memref.load %arg1[%c3_25] : memref<98xf32, #tpu.memory_space<smem>>
    %c0_26 = arith.constant 0 : index
    %c0_27 = arith.constant 0 : index
    %c3_28 = arith.constant 3 : index
    %34 = vector.load %arg4[%c0_26, %c0_27, %c3_28] : memref<2x22x22xf32, #tpu.memory_space<vmem>>, vector<1x16x16xf32>
    %35 = vector.shape_cast %34 : vector<1x16x16xf32> to vector<16x16xf32>
    %36 = vector.broadcast %33 : f32 to vector<16x16xf32>
    %37 = arith.mulf %36, %35 : vector<16x16xf32>
    %38 = arith.addf %32, %37 : vector<16x16xf32>
    %c4 = arith.constant 4 : index
    %39 = memref.load %arg1[%c4] : memref<98xf32, #tpu.memory_space<smem>>
    %c0_29 = arith.constant 0 : index
    %c0_30 = arith.constant 0 : index
    %c4_31 = arith.constant 4 : index
    %40 = vector.load %arg4[%c0_29, %c0_30, %c4_31] : memref<2x22x22xf32, #tpu.memory_space<vmem>>, vector<1x16x16xf32>
    %41 = vector.shape_cast %40 : vector<1x16x16xf32> to vector<16x16xf32>
    %42 = vector.broadcast %39 : f32 to vector<16x16xf32>
    %43 = arith.mulf %42, %41 : vector<16x16xf32>
    %44 = arith.addf %38, %43 : vector<16x16xf32>
    %c5 = arith.constant 5 : index
    %45 = memref.load %arg1[%c5] : memref<98xf32, #tpu.memory_space<smem>>
    %c0_32 = arith.constant 0 : index
    %c0_33 = arith.constant 0 : index
    %c5_34 = arith.constant 5 : index
    %46 = vector.load %arg4[%c0_32, %c0_33, %c5_34] : memref<2x22x22xf32, #tpu.memory_space<vmem>>, vector<1x16x16xf32>
    %47 = vector.shape_cast %46 : vector<1x16x16xf32> to vector<16x16xf32>
    %48 = vector.broadcast %45 : f32 to vector<16x16xf32>
    %49 = arith.mulf %48, %47 : vector<16x16xf32>
    %50 = arith.addf %44, %49 : vector<16x16xf32>
    %c6 = arith.constant 6 : index
    %51 = memref.load %arg1[%c6] : memref<98xf32, #tpu.memory_space<smem>>
    %c0_35 = arith.constant 0 : index
    %c0_36 = arith.constant 0 : index
    %c6_37 = arith.constant 6 : index
    %52 = vector.load %arg4[%c0_35, %c0_36, %c6_37] : memref<2x22x22xf32, #tpu.memory_space<vmem>>, vector<1x16x16xf32>
    %53 = vector.shape_cast %52 : vector<1x16x16xf32> to vector<16x16xf32>
    %54 = vector.broadcast %51 : f32 to vector<16x16xf32>
    %55 = arith.mulf %54, %53 : vector<16x16xf32>
    %56 = arith.addf %50, %55 : vector<16x16xf32>
    %c7 = arith.constant 7 : index
    %57 = memref.load %arg1[%c7] : memref<98xf32, #tpu.memory_space<smem>>
    %c0_38 = arith.constant 0 : index
    %c1_39 = arith.constant 1 : index
    %c0_40 = arith.constant 0 : index
    %58 = vector.load %arg4[%c0_38, %c1_39, %c0_40] : memref<2x22x22xf32, #tpu.memory_space<vmem>>, vector<1x16x16xf32>
    %59 = vector.shape_cast %58 : vector<1x16x16xf32> to vector<16x16xf32>
    %60 = vector.broadcast %57 : f32 to vector<16x16xf32>
    %61 = arith.mulf %60, %59 : vector<16x16xf32>
    %62 = arith.addf %56, %61 : vector<16x16xf32>
    %c8 = arith.constant 8 : index
    %63 = memref.load %arg1[%c8] : memref<98xf32, #tpu.memory_space<smem>>
    %c0_41 = arith.constant 0 : index
    %c1_42 = arith.constant 1 : index
    %c1_43 = arith.constant 1 : index
    %64 = vector.load %arg4[%c0_41, %c1_42, %c1_43] : memref<2x22x22xf32, #tpu.memory_space<vmem>>, vector<1x16x16xf32>
    %65 = vector.shape_cast %64 : vector<1x16x16xf32> to vector<16x16xf32>
    %66 = vector.broadcast %63 : f32 to vector<16x16xf32>
    %67 = arith.mulf %66, %65 : vector<16x16xf32>
    %68 = arith.addf %62, %67 : vector<16x16xf32>
    %c9 = arith.constant 9 : index
    %69 = memref.load %arg1[%c9] : memref<98xf32, #tpu.memory_space<smem>>
    %c0_44 = arith.constant 0 : index
    %c1_45 = arith.constant 1 : index
    %c2_46 = arith.constant 2 : index
    %70 = vector.load %arg4[%c0_44, %c1_45, %c2_46] : memref<2x22x22xf32, #tpu.memory_space<vmem>>, vector<1x16x16xf32>
    %71 = vector.shape_cast %70 : vector<1x16x16xf32> to vector<16x16xf32>
    %72 = vector.broadcast %69 : f32 to vector<16x16xf32>
    %73 = arith.mulf %72, %71 : vector<16x16xf32>
    %74 = arith.addf %68, %73 : vector<16x16xf32>
    %c10 = arith.constant 10 : index
    %75 = memref.load %arg1[%c10] : memref<98xf32, #tpu.memory_space<smem>>
    %c0_47 = arith.constant 0 : index
    %c1_48 = arith.constant 1 : index
    %c3_49 = arith.constant 3 : index
    %76 = vector.load %arg4[%c0_47, %c1_48, %c3_49] : memref<2x22x22xf32, #tpu.memory_space<vmem>>, vector<1x16x16xf32>
    %77 = vector.shape_cast %76 : vector<1x16x16xf32> to vector<16x16xf32>
    %78 = vector.broadcast %75 : f32 to vector<16x16xf32>
    %79 = arith.mulf %78, %77 : vector<16x16xf32>
    %80 = arith.addf %74, %79 : vector<16x16xf32>
    %c11 = arith.constant 11 : index
    %81 = memref.load %arg1[%c11] : memref<98xf32, #tpu.memory_space<smem>>
    %c0_50 = arith.constant 0 : index
    %c1_51 = arith.constant 1 : index
    %c4_52 = arith.constant 4 : index
    %82 = vector.load %arg4[%c0_50, %c1_51, %c4_52] : memref<2x22x22xf32, #tpu.memory_space<vmem>>, vector<1x16x16xf32>
    %83 = vector.shape_cast %82 : vector<1x16x16xf32> to vector<16x16xf32>
    %84 = vector.broadcast %81 : f32 to vector<16x16xf32>
    %85 = arith.mulf %84, %83 : vector<16x16xf32>
    %86 = arith.addf %80, %85 : vector<16x16xf32>
    %c12 = arith.constant 12 : index
    %87 = memref.load %arg1[%c12] : memref<98xf32, #tpu.memory_space<smem>>
    %c0_53 = arith.constant 0 : index
    %c1_54 = arith.constant 1 : index
    %c5_55 = arith.constant 5 : index
    %88 = vector.load %arg4[%c0_53, %c1_54, %c5_55] : memref<2x22x22xf32, #tpu.memory_space<vmem>>, vector<1x16x16xf32>
    %89 = vector.shape_cast %88 : vector<1x16x16xf32> to vector<16x16xf32>
    %90 = vector.broadcast %87 : f32 to vector<16x16xf32>
    %91 = arith.mulf %90, %89 : vector<16x16xf32>
    %92 = arith.addf %86, %91 : vector<16x16xf32>
    %c13 = arith.constant 13 : index
    %93 = memref.load %arg1[%c13] : memref<98xf32, #tpu.memory_space<smem>>
    %c0_56 = arith.constant 0 : index
    %c1_57 = arith.constant 1 : index
    %c6_58 = arith.constant 6 : index
    %94 = vector.load %arg4[%c0_56, %c1_57, %c6_58] : memref<2x22x22xf32, #tpu.memory_space<vmem>>, vector<1x16x16xf32>
    %95 = vector.shape_cast %94 : vector<1x16x16xf32> to vector<16x16xf32>
    %96 = vector.broadcast %93 : f32 to vector<16x16xf32>
    %97 = arith.mulf %96, %95 : vector<16x16xf32>
    %98 = arith.addf %92, %97 : vector<16x16xf32>
    %c14 = arith.constant 14 : index
    %99 = memref.load %arg1[%c14] : memref<98xf32, #tpu.memory_space<smem>>
    %c0_59 = arith.constant 0 : index
    %c2_60 = arith.constant 2 : index
    %c0_61 = arith.constant 0 : index
    %100 = vector.load %arg4[%c0_59, %c2_60, %c0_61] : memref<2x22x22xf32, #tpu.memory_space<vmem>>, vector<1x16x16xf32>
    %101 = vector.shape_cast %100 : vector<1x16x16xf32> to vector<16x16xf32>
    %102 = vector.broadcast %99 : f32 to vector<16x16xf32>
    %103 = arith.mulf %102, %101 : vector<16x16xf32>
    %104 = arith.addf %98, %103 : vector<16x16xf32>
    %c15 = arith.constant 15 : index
    %105 = memref.load %arg1[%c15] : memref<98xf32, #tpu.memory_space<smem>>
    %c0_62 = arith.constant 0 : index
    %c2_63 = arith.constant 2 : index
    %c1_64 = arith.constant 1 : index
    %106 = vector.load %arg4[%c0_62, %c2_63, %c1_64] : memref<2x22x22xf32, #tpu.memory_space<vmem>>, vector<1x16x16xf32>
    %107 = vector.shape_cast %106 : vector<1x16x16xf32> to vector<16x16xf32>
    %108 = vector.broadcast %105 : f32 to vector<16x16xf32>
    %109 = arith.mulf %108, %107 : vector<16x16xf32>
    %110 = arith.addf %104, %109 : vector<16x16xf32>
    %c16 = arith.constant 16 : index
    %111 = memref.load %arg1[%c16] : memref<98xf32, #tpu.memory_space<smem>>
    %c0_65 = arith.constant 0 : index
    %c2_66 = arith.constant 2 : index
    %c2_67 = arith.constant 2 : index
    %112 = vector.load %arg4[%c0_65, %c2_66, %c2_67] : memref<2x22x22xf32, #tpu.memory_space<vmem>>, vector<1x16x16xf32>
    %113 = vector.shape_cast %112 : vector<1x16x16xf32> to vector<16x16xf32>
    %114 = vector.broadcast %111 : f32 to vector<16x16xf32>
    %115 = arith.mulf %114, %113 : vector<16x16xf32>
    %116 = arith.addf %110, %115 : vector<16x16xf32>
    %c17 = arith.constant 17 : index
    %117 = memref.load %arg1[%c17] : memref<98xf32, #tpu.memory_space<smem>>
    %c0_68 = arith.constant 0 : index
    %c2_69 = arith.constant 2 : index
    %c3_70 = arith.constant 3 : index
    %118 = vector.load %arg4[%c0_68, %c2_69, %c3_70] : memref<2x22x22xf32, #tpu.memory_space<vmem>>, vector<1x16x16xf32>
    %119 = vector.shape_cast %118 : vector<1x16x16xf32> to vector<16x16xf32>
    %120 = vector.broadcast %117 : f32 to vector<16x16xf32>
    %121 = arith.mulf %120, %119 : vector<16x16xf32>
    %122 = arith.addf %116, %121 : vector<16x16xf32>
    %c18 = arith.constant 18 : index
    %123 = memref.load %arg1[%c18] : memref<98xf32, #tpu.memory_space<smem>>
    %c0_71 = arith.constant 0 : index
    %c2_72 = arith.constant 2 : index
    %c4_73 = arith.constant 4 : index
    %124 = vector.load %arg4[%c0_71, %c2_72, %c4_73] : memref<2x22x22xf32, #tpu.memory_space<vmem>>, vector<1x16x16xf32>
    %125 = vector.shape_cast %124 : vector<1x16x16xf32> to vector<16x16xf32>
    %126 = vector.broadcast %123 : f32 to vector<16x16xf32>
    %127 = arith.mulf %126, %125 : vector<16x16xf32>
    %128 = arith.addf %122, %127 : vector<16x16xf32>
    %c19 = arith.constant 19 : index
    %129 = memref.load %arg1[%c19] : memref<98xf32, #tpu.memory_space<smem>>
    %c0_74 = arith.constant 0 : index
    %c2_75 = arith.constant 2 : index
    %c5_76 = arith.constant 5 : index
    %130 = vector.load %arg4[%c0_74, %c2_75, %c5_76] : memref<2x22x22xf32, #tpu.memory_space<vmem>>, vector<1x16x16xf32>
    %131 = vector.shape_cast %130 : vector<1x16x16xf32> to vector<16x16xf32>
    %132 = vector.broadcast %129 : f32 to vector<16x16xf32>
    %133 = arith.mulf %132, %131 : vector<16x16xf32>
    %134 = arith.addf %128, %133 : vector<16x16xf32>
    %c20 = arith.constant 20 : index
    %135 = memref.load %arg1[%c20] : memref<98xf32, #tpu.memory_space<smem>>
    %c0_77 = arith.constant 0 : index
    %c2_78 = arith.constant 2 : index
    %c6_79 = arith.constant 6 : index
    %136 = vector.load %arg4[%c0_77, %c2_78, %c6_79] : memref<2x22x22xf32, #tpu.memory_space<vmem>>, vector<1x16x16xf32>
    %137 = vector.shape_cast %136 : vector<1x16x16xf32> to vector<16x16xf32>
    %138 = vector.broadcast %135 : f32 to vector<16x16xf32>
    %139 = arith.mulf %138, %137 : vector<16x16xf32>
    %140 = arith.addf %134, %139 : vector<16x16xf32>
    %c21 = arith.constant 21 : index
    %141 = memref.load %arg1[%c21] : memref<98xf32, #tpu.memory_space<smem>>
    %c0_80 = arith.constant 0 : index
    %c3_81 = arith.constant 3 : index
    %c0_82 = arith.constant 0 : index
    %142 = vector.load %arg4[%c0_80, %c3_81, %c0_82] : memref<2x22x22xf32, #tpu.memory_space<vmem>>, vector<1x16x16xf32>
    %143 = vector.shape_cast %142 : vector<1x16x16xf32> to vector<16x16xf32>
    %144 = vector.broadcast %141 : f32 to vector<16x16xf32>
    %145 = arith.mulf %144, %143 : vector<16x16xf32>
    %146 = arith.addf %140, %145 : vector<16x16xf32>
    %c22 = arith.constant 22 : index
    %147 = memref.load %arg1[%c22] : memref<98xf32, #tpu.memory_space<smem>>
    %c0_83 = arith.constant 0 : index
    %c3_84 = arith.constant 3 : index
    %c1_85 = arith.constant 1 : index
    %148 = vector.load %arg4[%c0_83, %c3_84, %c1_85] : memref<2x22x22xf32, #tpu.memory_space<vmem>>, vector<1x16x16xf32>
    %149 = vector.shape_cast %148 : vector<1x16x16xf32> to vector<16x16xf32>
    %150 = vector.broadcast %147 : f32 to vector<16x16xf32>
    %151 = arith.mulf %150, %149 : vector<16x16xf32>
    %152 = arith.addf %146, %151 : vector<16x16xf32>
    %c23 = arith.constant 23 : index
    %153 = memref.load %arg1[%c23] : memref<98xf32, #tpu.memory_space<smem>>
    %c0_86 = arith.constant 0 : index
    %c3_87 = arith.constant 3 : index
    %c2_88 = arith.constant 2 : index
    %154 = vector.load %arg4[%c0_86, %c3_87, %c2_88] : memref<2x22x22xf32, #tpu.memory_space<vmem>>, vector<1x16x16xf32>
    %155 = vector.shape_cast %154 : vector<1x16x16xf32> to vector<16x16xf32>
    %156 = vector.broadcast %153 : f32 to vector<16x16xf32>
    %157 = arith.mulf %156, %155 : vector<16x16xf32>
    %158 = arith.addf %152, %157 : vector<16x16xf32>
    %c24 = arith.constant 24 : index
    %159 = memref.load %arg1[%c24] : memref<98xf32, #tpu.memory_space<smem>>
    %c0_89 = arith.constant 0 : index
    %c3_90 = arith.constant 3 : index
    %c3_91 = arith.constant 3 : index
    %160 = vector.load %arg4[%c0_89, %c3_90, %c3_91] : memref<2x22x22xf32, #tpu.memory_space<vmem>>, vector<1x16x16xf32>
    %161 = vector.shape_cast %160 : vector<1x16x16xf32> to vector<16x16xf32>
    %162 = vector.broadcast %159 : f32 to vector<16x16xf32>
    %163 = arith.mulf %162, %161 : vector<16x16xf32>
    %164 = arith.addf %158, %163 : vector<16x16xf32>
    %c25 = arith.constant 25 : index
    %165 = memref.load %arg1[%c25] : memref<98xf32, #tpu.memory_space<smem>>
    %c0_92 = arith.constant 0 : index
    %c3_93 = arith.constant 3 : index
    %c4_94 = arith.constant 4 : index
    %166 = vector.load %arg4[%c0_92, %c3_93, %c4_94] : memref<2x22x22xf32, #tpu.memory_space<vmem>>, vector<1x16x16xf32>
    %167 = vector.shape_cast %166 : vector<1x16x16xf32> to vector<16x16xf32>
    %168 = vector.broadcast %165 : f32 to vector<16x16xf32>
    %169 = arith.mulf %168, %167 : vector<16x16xf32>
    %170 = arith.addf %164, %169 : vector<16x16xf32>
    %c26 = arith.constant 26 : index
    %171 = memref.load %arg1[%c26] : memref<98xf32, #tpu.memory_space<smem>>
    %c0_95 = arith.constant 0 : index
    %c3_96 = arith.constant 3 : index
    %c5_97 = arith.constant 5 : index
    %172 = vector.load %arg4[%c0_95, %c3_96, %c5_97] : memref<2x22x22xf32, #tpu.memory_space<vmem>>, vector<1x16x16xf32>
    %173 = vector.shape_cast %172 : vector<1x16x16xf32> to vector<16x16xf32>
    %174 = vector.broadcast %171 : f32 to vector<16x16xf32>
    %175 = arith.mulf %174, %173 : vector<16x16xf32>
    %176 = arith.addf %170, %175 : vector<16x16xf32>
    %c27 = arith.constant 27 : index
    %177 = memref.load %arg1[%c27] : memref<98xf32, #tpu.memory_space<smem>>
    %c0_98 = arith.constant 0 : index
    %c3_99 = arith.constant 3 : index
    %c6_100 = arith.constant 6 : index
    %178 = vector.load %arg4[%c0_98, %c3_99, %c6_100] : memref<2x22x22xf32, #tpu.memory_space<vmem>>, vector<1x16x16xf32>
    %179 = vector.shape_cast %178 : vector<1x16x16xf32> to vector<16x16xf32>
    %180 = vector.broadcast %177 : f32 to vector<16x16xf32>
    %181 = arith.mulf %180, %179 : vector<16x16xf32>
    %182 = arith.addf %176, %181 : vector<16x16xf32>
    %c28 = arith.constant 28 : index
    %183 = memref.load %arg1[%c28] : memref<98xf32, #tpu.memory_space<smem>>
    %c0_101 = arith.constant 0 : index
    %c4_102 = arith.constant 4 : index
    %c0_103 = arith.constant 0 : index
    %184 = vector.load %arg4[%c0_101, %c4_102, %c0_103] : memref<2x22x22xf32, #tpu.memory_space<vmem>>, vector<1x16x16xf32>
    %185 = vector.shape_cast %184 : vector<1x16x16xf32> to vector<16x16xf32>
    %186 = vector.broadcast %183 : f32 to vector<16x16xf32>
    %187 = arith.mulf %186, %185 : vector<16x16xf32>
    %188 = arith.addf %182, %187 : vector<16x16xf32>
    %c29 = arith.constant 29 : index
    %189 = memref.load %arg1[%c29] : memref<98xf32, #tpu.memory_space<smem>>
    %c0_104 = arith.constant 0 : index
    %c4_105 = arith.constant 4 : index
    %c1_106 = arith.constant 1 : index
    %190 = vector.load %arg4[%c0_104, %c4_105, %c1_106] : memref<2x22x22xf32, #tpu.memory_space<vmem>>, vector<1x16x16xf32>
    %191 = vector.shape_cast %190 : vector<1x16x16xf32> to vector<16x16xf32>
    %192 = vector.broadcast %189 : f32 to vector<16x16xf32>
    %193 = arith.mulf %192, %191 : vector<16x16xf32>
    %194 = arith.addf %188, %193 : vector<16x16xf32>
    %c30 = arith.constant 30 : index
    %195 = memref.load %arg1[%c30] : memref<98xf32, #tpu.memory_space<smem>>
    %c0_107 = arith.constant 0 : index
    %c4_108 = arith.constant 4 : index
    %c2_109 = arith.constant 2 : index
    %196 = vector.load %arg4[%c0_107, %c4_108, %c2_109] : memref<2x22x22xf32, #tpu.memory_space<vmem>>, vector<1x16x16xf32>
    %197 = vector.shape_cast %196 : vector<1x16x16xf32> to vector<16x16xf32>
    %198 = vector.broadcast %195 : f32 to vector<16x16xf32>
    %199 = arith.mulf %198, %197 : vector<16x16xf32>
    %200 = arith.addf %194, %199 : vector<16x16xf32>
    %c31 = arith.constant 31 : index
    %201 = memref.load %arg1[%c31] : memref<98xf32, #tpu.memory_space<smem>>
    %c0_110 = arith.constant 0 : index
    %c4_111 = arith.constant 4 : index
    %c3_112 = arith.constant 3 : index
    %202 = vector.load %arg4[%c0_110, %c4_111, %c3_112] : memref<2x22x22xf32, #tpu.memory_space<vmem>>, vector<1x16x16xf32>
    %203 = vector.shape_cast %202 : vector<1x16x16xf32> to vector<16x16xf32>
    %204 = vector.broadcast %201 : f32 to vector<16x16xf32>
    %205 = arith.mulf %204, %203 : vector<16x16xf32>
    %206 = arith.addf %200, %205 : vector<16x16xf32>
    %c32 = arith.constant 32 : index
    %207 = memref.load %arg1[%c32] : memref<98xf32, #tpu.memory_space<smem>>
    %c0_113 = arith.constant 0 : index
    %c4_114 = arith.constant 4 : index
    %c4_115 = arith.constant 4 : index
    %208 = vector.load %arg4[%c0_113, %c4_114, %c4_115] : memref<2x22x22xf32, #tpu.memory_space<vmem>>, vector<1x16x16xf32>
    %209 = vector.shape_cast %208 : vector<1x16x16xf32> to vector<16x16xf32>
    %210 = vector.broadcast %207 : f32 to vector<16x16xf32>
    %211 = arith.mulf %210, %209 : vector<16x16xf32>
    %212 = arith.addf %206, %211 : vector<16x16xf32>
    %c33 = arith.constant 33 : index
    %213 = memref.load %arg1[%c33] : memref<98xf32, #tpu.memory_space<smem>>
    %c0_116 = arith.constant 0 : index
    %c4_117 = arith.constant 4 : index
    %c5_118 = arith.constant 5 : index
    %214 = vector.load %arg4[%c0_116, %c4_117, %c5_118] : memref<2x22x22xf32, #tpu.memory_space<vmem>>, vector<1x16x16xf32>
    %215 = vector.shape_cast %214 : vector<1x16x16xf32> to vector<16x16xf32>
    %216 = vector.broadcast %213 : f32 to vector<16x16xf32>
    %217 = arith.mulf %216, %215 : vector<16x16xf32>
    %218 = arith.addf %212, %217 : vector<16x16xf32>
    %c34 = arith.constant 34 : index
    %219 = memref.load %arg1[%c34] : memref<98xf32, #tpu.memory_space<smem>>
    %c0_119 = arith.constant 0 : index
    %c4_120 = arith.constant 4 : index
    %c6_121 = arith.constant 6 : index
    %220 = vector.load %arg4[%c0_119, %c4_120, %c6_121] : memref<2x22x22xf32, #tpu.memory_space<vmem>>, vector<1x16x16xf32>
    %221 = vector.shape_cast %220 : vector<1x16x16xf32> to vector<16x16xf32>
    %222 = vector.broadcast %219 : f32 to vector<16x16xf32>
    %223 = arith.mulf %222, %221 : vector<16x16xf32>
    %224 = arith.addf %218, %223 : vector<16x16xf32>
    %c35 = arith.constant 35 : index
    %225 = memref.load %arg1[%c35] : memref<98xf32, #tpu.memory_space<smem>>
    %c0_122 = arith.constant 0 : index
    %c5_123 = arith.constant 5 : index
    %c0_124 = arith.constant 0 : index
    %226 = vector.load %arg4[%c0_122, %c5_123, %c0_124] : memref<2x22x22xf32, #tpu.memory_space<vmem>>, vector<1x16x16xf32>
    %227 = vector.shape_cast %226 : vector<1x16x16xf32> to vector<16x16xf32>
    %228 = vector.broadcast %225 : f32 to vector<16x16xf32>
    %229 = arith.mulf %228, %227 : vector<16x16xf32>
    %230 = arith.addf %224, %229 : vector<16x16xf32>
    %c36 = arith.constant 36 : index
    %231 = memref.load %arg1[%c36] : memref<98xf32, #tpu.memory_space<smem>>
    %c0_125 = arith.constant 0 : index
    %c5_126 = arith.constant 5 : index
    %c1_127 = arith.constant 1 : index
    %232 = vector.load %arg4[%c0_125, %c5_126, %c1_127] : memref<2x22x22xf32, #tpu.memory_space<vmem>>, vector<1x16x16xf32>
    %233 = vector.shape_cast %232 : vector<1x16x16xf32> to vector<16x16xf32>
    %234 = vector.broadcast %231 : f32 to vector<16x16xf32>
    %235 = arith.mulf %234, %233 : vector<16x16xf32>
    %236 = arith.addf %230, %235 : vector<16x16xf32>
    %c37 = arith.constant 37 : index
    %237 = memref.load %arg1[%c37] : memref<98xf32, #tpu.memory_space<smem>>
    %c0_128 = arith.constant 0 : index
    %c5_129 = arith.constant 5 : index
    %c2_130 = arith.constant 2 : index
    %238 = vector.load %arg4[%c0_128, %c5_129, %c2_130] : memref<2x22x22xf32, #tpu.memory_space<vmem>>, vector<1x16x16xf32>
    %239 = vector.shape_cast %238 : vector<1x16x16xf32> to vector<16x16xf32>
    %240 = vector.broadcast %237 : f32 to vector<16x16xf32>
    %241 = arith.mulf %240, %239 : vector<16x16xf32>
    %242 = arith.addf %236, %241 : vector<16x16xf32>
    %c38 = arith.constant 38 : index
    %243 = memref.load %arg1[%c38] : memref<98xf32, #tpu.memory_space<smem>>
    %c0_131 = arith.constant 0 : index
    %c5_132 = arith.constant 5 : index
    %c3_133 = arith.constant 3 : index
    %244 = vector.load %arg4[%c0_131, %c5_132, %c3_133] : memref<2x22x22xf32, #tpu.memory_space<vmem>>, vector<1x16x16xf32>
    %245 = vector.shape_cast %244 : vector<1x16x16xf32> to vector<16x16xf32>
    %246 = vector.broadcast %243 : f32 to vector<16x16xf32>
    %247 = arith.mulf %246, %245 : vector<16x16xf32>
    %248 = arith.addf %242, %247 : vector<16x16xf32>
    %c39 = arith.constant 39 : index
    %249 = memref.load %arg1[%c39] : memref<98xf32, #tpu.memory_space<smem>>
    %c0_134 = arith.constant 0 : index
    %c5_135 = arith.constant 5 : index
    %c4_136 = arith.constant 4 : index
    %250 = vector.load %arg4[%c0_134, %c5_135, %c4_136] : memref<2x22x22xf32, #tpu.memory_space<vmem>>, vector<1x16x16xf32>
    %251 = vector.shape_cast %250 : vector<1x16x16xf32> to vector<16x16xf32>
    %252 = vector.broadcast %249 : f32 to vector<16x16xf32>
    %253 = arith.mulf %252, %251 : vector<16x16xf32>
    %254 = arith.addf %248, %253 : vector<16x16xf32>
    %c40 = arith.constant 40 : index
    %255 = memref.load %arg1[%c40] : memref<98xf32, #tpu.memory_space<smem>>
    %c0_137 = arith.constant 0 : index
    %c5_138 = arith.constant 5 : index
    %c5_139 = arith.constant 5 : index
    %256 = vector.load %arg4[%c0_137, %c5_138, %c5_139] : memref<2x22x22xf32, #tpu.memory_space<vmem>>, vector<1x16x16xf32>
    %257 = vector.shape_cast %256 : vector<1x16x16xf32> to vector<16x16xf32>
    %258 = vector.broadcast %255 : f32 to vector<16x16xf32>
    %259 = arith.mulf %258, %257 : vector<16x16xf32>
    %260 = arith.addf %254, %259 : vector<16x16xf32>
    %c41 = arith.constant 41 : index
    %261 = memref.load %arg1[%c41] : memref<98xf32, #tpu.memory_space<smem>>
    %c0_140 = arith.constant 0 : index
    %c5_141 = arith.constant 5 : index
    %c6_142 = arith.constant 6 : index
    %262 = vector.load %arg4[%c0_140, %c5_141, %c6_142] : memref<2x22x22xf32, #tpu.memory_space<vmem>>, vector<1x16x16xf32>
    %263 = vector.shape_cast %262 : vector<1x16x16xf32> to vector<16x16xf32>
    %264 = vector.broadcast %261 : f32 to vector<16x16xf32>
    %265 = arith.mulf %264, %263 : vector<16x16xf32>
    %266 = arith.addf %260, %265 : vector<16x16xf32>
    %c42 = arith.constant 42 : index
    %267 = memref.load %arg1[%c42] : memref<98xf32, #tpu.memory_space<smem>>
    %c0_143 = arith.constant 0 : index
    %c6_144 = arith.constant 6 : index
    %c0_145 = arith.constant 0 : index
    %268 = vector.load %arg4[%c0_143, %c6_144, %c0_145] : memref<2x22x22xf32, #tpu.memory_space<vmem>>, vector<1x16x16xf32>
    %269 = vector.shape_cast %268 : vector<1x16x16xf32> to vector<16x16xf32>
    %270 = vector.broadcast %267 : f32 to vector<16x16xf32>
    %271 = arith.mulf %270, %269 : vector<16x16xf32>
    %272 = arith.addf %266, %271 : vector<16x16xf32>
    %c43 = arith.constant 43 : index
    %273 = memref.load %arg1[%c43] : memref<98xf32, #tpu.memory_space<smem>>
    %c0_146 = arith.constant 0 : index
    %c6_147 = arith.constant 6 : index
    %c1_148 = arith.constant 1 : index
    %274 = vector.load %arg4[%c0_146, %c6_147, %c1_148] : memref<2x22x22xf32, #tpu.memory_space<vmem>>, vector<1x16x16xf32>
    %275 = vector.shape_cast %274 : vector<1x16x16xf32> to vector<16x16xf32>
    %276 = vector.broadcast %273 : f32 to vector<16x16xf32>
    %277 = arith.mulf %276, %275 : vector<16x16xf32>
    %278 = arith.addf %272, %277 : vector<16x16xf32>
    %c44 = arith.constant 44 : index
    %279 = memref.load %arg1[%c44] : memref<98xf32, #tpu.memory_space<smem>>
    %c0_149 = arith.constant 0 : index
    %c6_150 = arith.constant 6 : index
    %c2_151 = arith.constant 2 : index
    %280 = vector.load %arg4[%c0_149, %c6_150, %c2_151] : memref<2x22x22xf32, #tpu.memory_space<vmem>>, vector<1x16x16xf32>
    %281 = vector.shape_cast %280 : vector<1x16x16xf32> to vector<16x16xf32>
    %282 = vector.broadcast %279 : f32 to vector<16x16xf32>
    %283 = arith.mulf %282, %281 : vector<16x16xf32>
    %284 = arith.addf %278, %283 : vector<16x16xf32>
    %c45 = arith.constant 45 : index
    %285 = memref.load %arg1[%c45] : memref<98xf32, #tpu.memory_space<smem>>
    %c0_152 = arith.constant 0 : index
    %c6_153 = arith.constant 6 : index
    %c3_154 = arith.constant 3 : index
    %286 = vector.load %arg4[%c0_152, %c6_153, %c3_154] : memref<2x22x22xf32, #tpu.memory_space<vmem>>, vector<1x16x16xf32>
    %287 = vector.shape_cast %286 : vector<1x16x16xf32> to vector<16x16xf32>
    %288 = vector.broadcast %285 : f32 to vector<16x16xf32>
    %289 = arith.mulf %288, %287 : vector<16x16xf32>
    %290 = arith.addf %284, %289 : vector<16x16xf32>
    %c46 = arith.constant 46 : index
    %291 = memref.load %arg1[%c46] : memref<98xf32, #tpu.memory_space<smem>>
    %c0_155 = arith.constant 0 : index
    %c6_156 = arith.constant 6 : index
    %c4_157 = arith.constant 4 : index
    %292 = vector.load %arg4[%c0_155, %c6_156, %c4_157] : memref<2x22x22xf32, #tpu.memory_space<vmem>>, vector<1x16x16xf32>
    %293 = vector.shape_cast %292 : vector<1x16x16xf32> to vector<16x16xf32>
    %294 = vector.broadcast %291 : f32 to vector<16x16xf32>
    %295 = arith.mulf %294, %293 : vector<16x16xf32>
    %296 = arith.addf %290, %295 : vector<16x16xf32>
    %c47 = arith.constant 47 : index
    %297 = memref.load %arg1[%c47] : memref<98xf32, #tpu.memory_space<smem>>
    %c0_158 = arith.constant 0 : index
    %c6_159 = arith.constant 6 : index
    %c5_160 = arith.constant 5 : index
    %298 = vector.load %arg4[%c0_158, %c6_159, %c5_160] : memref<2x22x22xf32, #tpu.memory_space<vmem>>, vector<1x16x16xf32>
    %299 = vector.shape_cast %298 : vector<1x16x16xf32> to vector<16x16xf32>
    %300 = vector.broadcast %297 : f32 to vector<16x16xf32>
    %301 = arith.mulf %300, %299 : vector<16x16xf32>
    %302 = arith.addf %296, %301 : vector<16x16xf32>
    %c48 = arith.constant 48 : index
    %303 = memref.load %arg1[%c48] : memref<98xf32, #tpu.memory_space<smem>>
    %c0_161 = arith.constant 0 : index
    %c6_162 = arith.constant 6 : index
    %c6_163 = arith.constant 6 : index
    %304 = vector.load %arg4[%c0_161, %c6_162, %c6_163] : memref<2x22x22xf32, #tpu.memory_space<vmem>>, vector<1x16x16xf32>
    %305 = vector.shape_cast %304 : vector<1x16x16xf32> to vector<16x16xf32>
    %306 = vector.broadcast %303 : f32 to vector<16x16xf32>
    %307 = arith.mulf %306, %305 : vector<16x16xf32>
    %308 = arith.addf %302, %307 : vector<16x16xf32>
    %c49 = arith.constant 49 : index
    %309 = memref.load %arg1[%c49] : memref<98xf32, #tpu.memory_space<smem>>
    %c1_164 = arith.constant 1 : index
    %c0_165 = arith.constant 0 : index
    %c0_166 = arith.constant 0 : index
    %310 = vector.load %arg4[%c1_164, %c0_165, %c0_166] : memref<2x22x22xf32, #tpu.memory_space<vmem>>, vector<1x16x16xf32>
    %311 = vector.shape_cast %310 : vector<1x16x16xf32> to vector<16x16xf32>
    %312 = vector.broadcast %309 : f32 to vector<16x16xf32>
    %313 = arith.mulf %312, %311 : vector<16x16xf32>
    %314 = arith.addf %308, %313 : vector<16x16xf32>
    %c50 = arith.constant 50 : index
    %315 = memref.load %arg1[%c50] : memref<98xf32, #tpu.memory_space<smem>>
    %c1_167 = arith.constant 1 : index
    %c0_168 = arith.constant 0 : index
    %c1_169 = arith.constant 1 : index
    %316 = vector.load %arg4[%c1_167, %c0_168, %c1_169] : memref<2x22x22xf32, #tpu.memory_space<vmem>>, vector<1x16x16xf32>
    %317 = vector.shape_cast %316 : vector<1x16x16xf32> to vector<16x16xf32>
    %318 = vector.broadcast %315 : f32 to vector<16x16xf32>
    %319 = arith.mulf %318, %317 : vector<16x16xf32>
    %320 = arith.addf %314, %319 : vector<16x16xf32>
    %c51 = arith.constant 51 : index
    %321 = memref.load %arg1[%c51] : memref<98xf32, #tpu.memory_space<smem>>
    %c1_170 = arith.constant 1 : index
    %c0_171 = arith.constant 0 : index
    %c2_172 = arith.constant 2 : index
    %322 = vector.load %arg4[%c1_170, %c0_171, %c2_172] : memref<2x22x22xf32, #tpu.memory_space<vmem>>, vector<1x16x16xf32>
    %323 = vector.shape_cast %322 : vector<1x16x16xf32> to vector<16x16xf32>
    %324 = vector.broadcast %321 : f32 to vector<16x16xf32>
    %325 = arith.mulf %324, %323 : vector<16x16xf32>
    %326 = arith.addf %320, %325 : vector<16x16xf32>
    %c52 = arith.constant 52 : index
    %327 = memref.load %arg1[%c52] : memref<98xf32, #tpu.memory_space<smem>>
    %c1_173 = arith.constant 1 : index
    %c0_174 = arith.constant 0 : index
    %c3_175 = arith.constant 3 : index
    %328 = vector.load %arg4[%c1_173, %c0_174, %c3_175] : memref<2x22x22xf32, #tpu.memory_space<vmem>>, vector<1x16x16xf32>
    %329 = vector.shape_cast %328 : vector<1x16x16xf32> to vector<16x16xf32>
    %330 = vector.broadcast %327 : f32 to vector<16x16xf32>
    %331 = arith.mulf %330, %329 : vector<16x16xf32>
    %332 = arith.addf %326, %331 : vector<16x16xf32>
    %c53 = arith.constant 53 : index
    %333 = memref.load %arg1[%c53] : memref<98xf32, #tpu.memory_space<smem>>
    %c1_176 = arith.constant 1 : index
    %c0_177 = arith.constant 0 : index
    %c4_178 = arith.constant 4 : index
    %334 = vector.load %arg4[%c1_176, %c0_177, %c4_178] : memref<2x22x22xf32, #tpu.memory_space<vmem>>, vector<1x16x16xf32>
    %335 = vector.shape_cast %334 : vector<1x16x16xf32> to vector<16x16xf32>
    %336 = vector.broadcast %333 : f32 to vector<16x16xf32>
    %337 = arith.mulf %336, %335 : vector<16x16xf32>
    %338 = arith.addf %332, %337 : vector<16x16xf32>
    %c54 = arith.constant 54 : index
    %339 = memref.load %arg1[%c54] : memref<98xf32, #tpu.memory_space<smem>>
    %c1_179 = arith.constant 1 : index
    %c0_180 = arith.constant 0 : index
    %c5_181 = arith.constant 5 : index
    %340 = vector.load %arg4[%c1_179, %c0_180, %c5_181] : memref<2x22x22xf32, #tpu.memory_space<vmem>>, vector<1x16x16xf32>
    %341 = vector.shape_cast %340 : vector<1x16x16xf32> to vector<16x16xf32>
    %342 = vector.broadcast %339 : f32 to vector<16x16xf32>
    %343 = arith.mulf %342, %341 : vector<16x16xf32>
    %344 = arith.addf %338, %343 : vector<16x16xf32>
    %c55 = arith.constant 55 : index
    %345 = memref.load %arg1[%c55] : memref<98xf32, #tpu.memory_space<smem>>
    %c1_182 = arith.constant 1 : index
    %c0_183 = arith.constant 0 : index
    %c6_184 = arith.constant 6 : index
    %346 = vector.load %arg4[%c1_182, %c0_183, %c6_184] : memref<2x22x22xf32, #tpu.memory_space<vmem>>, vector<1x16x16xf32>
    %347 = vector.shape_cast %346 : vector<1x16x16xf32> to vector<16x16xf32>
    %348 = vector.broadcast %345 : f32 to vector<16x16xf32>
    %349 = arith.mulf %348, %347 : vector<16x16xf32>
    %350 = arith.addf %344, %349 : vector<16x16xf32>
    %c56 = arith.constant 56 : index
    %351 = memref.load %arg1[%c56] : memref<98xf32, #tpu.memory_space<smem>>
    %c1_185 = arith.constant 1 : index
    %c1_186 = arith.constant 1 : index
    %c0_187 = arith.constant 0 : index
    %352 = vector.load %arg4[%c1_185, %c1_186, %c0_187] : memref<2x22x22xf32, #tpu.memory_space<vmem>>, vector<1x16x16xf32>
    %353 = vector.shape_cast %352 : vector<1x16x16xf32> to vector<16x16xf32>
    %354 = vector.broadcast %351 : f32 to vector<16x16xf32>
    %355 = arith.mulf %354, %353 : vector<16x16xf32>
    %356 = arith.addf %350, %355 : vector<16x16xf32>
    %c57 = arith.constant 57 : index
    %357 = memref.load %arg1[%c57] : memref<98xf32, #tpu.memory_space<smem>>
    %c1_188 = arith.constant 1 : index
    %c1_189 = arith.constant 1 : index
    %c1_190 = arith.constant 1 : index
    %358 = vector.load %arg4[%c1_188, %c1_189, %c1_190] : memref<2x22x22xf32, #tpu.memory_space<vmem>>, vector<1x16x16xf32>
    %359 = vector.shape_cast %358 : vector<1x16x16xf32> to vector<16x16xf32>
    %360 = vector.broadcast %357 : f32 to vector<16x16xf32>
    %361 = arith.mulf %360, %359 : vector<16x16xf32>
    %362 = arith.addf %356, %361 : vector<16x16xf32>
    %c58 = arith.constant 58 : index
    %363 = memref.load %arg1[%c58] : memref<98xf32, #tpu.memory_space<smem>>
    %c1_191 = arith.constant 1 : index
    %c1_192 = arith.constant 1 : index
    %c2_193 = arith.constant 2 : index
    %364 = vector.load %arg4[%c1_191, %c1_192, %c2_193] : memref<2x22x22xf32, #tpu.memory_space<vmem>>, vector<1x16x16xf32>
    %365 = vector.shape_cast %364 : vector<1x16x16xf32> to vector<16x16xf32>
    %366 = vector.broadcast %363 : f32 to vector<16x16xf32>
    %367 = arith.mulf %366, %365 : vector<16x16xf32>
    %368 = arith.addf %362, %367 : vector<16x16xf32>
    %c59 = arith.constant 59 : index
    %369 = memref.load %arg1[%c59] : memref<98xf32, #tpu.memory_space<smem>>
    %c1_194 = arith.constant 1 : index
    %c1_195 = arith.constant 1 : index
    %c3_196 = arith.constant 3 : index
    %370 = vector.load %arg4[%c1_194, %c1_195, %c3_196] : memref<2x22x22xf32, #tpu.memory_space<vmem>>, vector<1x16x16xf32>
    %371 = vector.shape_cast %370 : vector<1x16x16xf32> to vector<16x16xf32>
    %372 = vector.broadcast %369 : f32 to vector<16x16xf32>
    %373 = arith.mulf %372, %371 : vector<16x16xf32>
    %374 = arith.addf %368, %373 : vector<16x16xf32>
    %c60 = arith.constant 60 : index
    %375 = memref.load %arg1[%c60] : memref<98xf32, #tpu.memory_space<smem>>
    %c1_197 = arith.constant 1 : index
    %c1_198 = arith.constant 1 : index
    %c4_199 = arith.constant 4 : index
    %376 = vector.load %arg4[%c1_197, %c1_198, %c4_199] : memref<2x22x22xf32, #tpu.memory_space<vmem>>, vector<1x16x16xf32>
    %377 = vector.shape_cast %376 : vector<1x16x16xf32> to vector<16x16xf32>
    %378 = vector.broadcast %375 : f32 to vector<16x16xf32>
    %379 = arith.mulf %378, %377 : vector<16x16xf32>
    %380 = arith.addf %374, %379 : vector<16x16xf32>
    %c61 = arith.constant 61 : index
    %381 = memref.load %arg1[%c61] : memref<98xf32, #tpu.memory_space<smem>>
    %c1_200 = arith.constant 1 : index
    %c1_201 = arith.constant 1 : index
    %c5_202 = arith.constant 5 : index
    %382 = vector.load %arg4[%c1_200, %c1_201, %c5_202] : memref<2x22x22xf32, #tpu.memory_space<vmem>>, vector<1x16x16xf32>
    %383 = vector.shape_cast %382 : vector<1x16x16xf32> to vector<16x16xf32>
    %384 = vector.broadcast %381 : f32 to vector<16x16xf32>
    %385 = arith.mulf %384, %383 : vector<16x16xf32>
    %386 = arith.addf %380, %385 : vector<16x16xf32>
    %c62 = arith.constant 62 : index
    %387 = memref.load %arg1[%c62] : memref<98xf32, #tpu.memory_space<smem>>
    %c1_203 = arith.constant 1 : index
    %c1_204 = arith.constant 1 : index
    %c6_205 = arith.constant 6 : index
    %388 = vector.load %arg4[%c1_203, %c1_204, %c6_205] : memref<2x22x22xf32, #tpu.memory_space<vmem>>, vector<1x16x16xf32>
    %389 = vector.shape_cast %388 : vector<1x16x16xf32> to vector<16x16xf32>
    %390 = vector.broadcast %387 : f32 to vector<16x16xf32>
    %391 = arith.mulf %390, %389 : vector<16x16xf32>
    %392 = arith.addf %386, %391 : vector<16x16xf32>
    %c63 = arith.constant 63 : index
    %393 = memref.load %arg1[%c63] : memref<98xf32, #tpu.memory_space<smem>>
    %c1_206 = arith.constant 1 : index
    %c2_207 = arith.constant 2 : index
    %c0_208 = arith.constant 0 : index
    %394 = vector.load %arg4[%c1_206, %c2_207, %c0_208] : memref<2x22x22xf32, #tpu.memory_space<vmem>>, vector<1x16x16xf32>
    %395 = vector.shape_cast %394 : vector<1x16x16xf32> to vector<16x16xf32>
    %396 = vector.broadcast %393 : f32 to vector<16x16xf32>
    %397 = arith.mulf %396, %395 : vector<16x16xf32>
    %398 = arith.addf %392, %397 : vector<16x16xf32>
    %c64 = arith.constant 64 : index
    %399 = memref.load %arg1[%c64] : memref<98xf32, #tpu.memory_space<smem>>
    %c1_209 = arith.constant 1 : index
    %c2_210 = arith.constant 2 : index
    %c1_211 = arith.constant 1 : index
    %400 = vector.load %arg4[%c1_209, %c2_210, %c1_211] : memref<2x22x22xf32, #tpu.memory_space<vmem>>, vector<1x16x16xf32>
    %401 = vector.shape_cast %400 : vector<1x16x16xf32> to vector<16x16xf32>
    %402 = vector.broadcast %399 : f32 to vector<16x16xf32>
    %403 = arith.mulf %402, %401 : vector<16x16xf32>
    %404 = arith.addf %398, %403 : vector<16x16xf32>
    %c65 = arith.constant 65 : index
    %405 = memref.load %arg1[%c65] : memref<98xf32, #tpu.memory_space<smem>>
    %c1_212 = arith.constant 1 : index
    %c2_213 = arith.constant 2 : index
    %c2_214 = arith.constant 2 : index
    %406 = vector.load %arg4[%c1_212, %c2_213, %c2_214] : memref<2x22x22xf32, #tpu.memory_space<vmem>>, vector<1x16x16xf32>
    %407 = vector.shape_cast %406 : vector<1x16x16xf32> to vector<16x16xf32>
    %408 = vector.broadcast %405 : f32 to vector<16x16xf32>
    %409 = arith.mulf %408, %407 : vector<16x16xf32>
    %410 = arith.addf %404, %409 : vector<16x16xf32>
    %c66 = arith.constant 66 : index
    %411 = memref.load %arg1[%c66] : memref<98xf32, #tpu.memory_space<smem>>
    %c1_215 = arith.constant 1 : index
    %c2_216 = arith.constant 2 : index
    %c3_217 = arith.constant 3 : index
    %412 = vector.load %arg4[%c1_215, %c2_216, %c3_217] : memref<2x22x22xf32, #tpu.memory_space<vmem>>, vector<1x16x16xf32>
    %413 = vector.shape_cast %412 : vector<1x16x16xf32> to vector<16x16xf32>
    %414 = vector.broadcast %411 : f32 to vector<16x16xf32>
    %415 = arith.mulf %414, %413 : vector<16x16xf32>
    %416 = arith.addf %410, %415 : vector<16x16xf32>
    %c67 = arith.constant 67 : index
    %417 = memref.load %arg1[%c67] : memref<98xf32, #tpu.memory_space<smem>>
    %c1_218 = arith.constant 1 : index
    %c2_219 = arith.constant 2 : index
    %c4_220 = arith.constant 4 : index
    %418 = vector.load %arg4[%c1_218, %c2_219, %c4_220] : memref<2x22x22xf32, #tpu.memory_space<vmem>>, vector<1x16x16xf32>
    %419 = vector.shape_cast %418 : vector<1x16x16xf32> to vector<16x16xf32>
    %420 = vector.broadcast %417 : f32 to vector<16x16xf32>
    %421 = arith.mulf %420, %419 : vector<16x16xf32>
    %422 = arith.addf %416, %421 : vector<16x16xf32>
    %c68 = arith.constant 68 : index
    %423 = memref.load %arg1[%c68] : memref<98xf32, #tpu.memory_space<smem>>
    %c1_221 = arith.constant 1 : index
    %c2_222 = arith.constant 2 : index
    %c5_223 = arith.constant 5 : index
    %424 = vector.load %arg4[%c1_221, %c2_222, %c5_223] : memref<2x22x22xf32, #tpu.memory_space<vmem>>, vector<1x16x16xf32>
    %425 = vector.shape_cast %424 : vector<1x16x16xf32> to vector<16x16xf32>
    %426 = vector.broadcast %423 : f32 to vector<16x16xf32>
    %427 = arith.mulf %426, %425 : vector<16x16xf32>
    %428 = arith.addf %422, %427 : vector<16x16xf32>
    %c69 = arith.constant 69 : index
    %429 = memref.load %arg1[%c69] : memref<98xf32, #tpu.memory_space<smem>>
    %c1_224 = arith.constant 1 : index
    %c2_225 = arith.constant 2 : index
    %c6_226 = arith.constant 6 : index
    %430 = vector.load %arg4[%c1_224, %c2_225, %c6_226] : memref<2x22x22xf32, #tpu.memory_space<vmem>>, vector<1x16x16xf32>
    %431 = vector.shape_cast %430 : vector<1x16x16xf32> to vector<16x16xf32>
    %432 = vector.broadcast %429 : f32 to vector<16x16xf32>
    %433 = arith.mulf %432, %431 : vector<16x16xf32>
    %434 = arith.addf %428, %433 : vector<16x16xf32>
    %c70 = arith.constant 70 : index
    %435 = memref.load %arg1[%c70] : memref<98xf32, #tpu.memory_space<smem>>
    %c1_227 = arith.constant 1 : index
    %c3_228 = arith.constant 3 : index
    %c0_229 = arith.constant 0 : index
    %436 = vector.load %arg4[%c1_227, %c3_228, %c0_229] : memref<2x22x22xf32, #tpu.memory_space<vmem>>, vector<1x16x16xf32>
    %437 = vector.shape_cast %436 : vector<1x16x16xf32> to vector<16x16xf32>
    %438 = vector.broadcast %435 : f32 to vector<16x16xf32>
    %439 = arith.mulf %438, %437 : vector<16x16xf32>
    %440 = arith.addf %434, %439 : vector<16x16xf32>
    %c71 = arith.constant 71 : index
    %441 = memref.load %arg1[%c71] : memref<98xf32, #tpu.memory_space<smem>>
    %c1_230 = arith.constant 1 : index
    %c3_231 = arith.constant 3 : index
    %c1_232 = arith.constant 1 : index
    %442 = vector.load %arg4[%c1_230, %c3_231, %c1_232] : memref<2x22x22xf32, #tpu.memory_space<vmem>>, vector<1x16x16xf32>
    %443 = vector.shape_cast %442 : vector<1x16x16xf32> to vector<16x16xf32>
    %444 = vector.broadcast %441 : f32 to vector<16x16xf32>
    %445 = arith.mulf %444, %443 : vector<16x16xf32>
    %446 = arith.addf %440, %445 : vector<16x16xf32>
    %c72 = arith.constant 72 : index
    %447 = memref.load %arg1[%c72] : memref<98xf32, #tpu.memory_space<smem>>
    %c1_233 = arith.constant 1 : index
    %c3_234 = arith.constant 3 : index
    %c2_235 = arith.constant 2 : index
    %448 = vector.load %arg4[%c1_233, %c3_234, %c2_235] : memref<2x22x22xf32, #tpu.memory_space<vmem>>, vector<1x16x16xf32>
    %449 = vector.shape_cast %448 : vector<1x16x16xf32> to vector<16x16xf32>
    %450 = vector.broadcast %447 : f32 to vector<16x16xf32>
    %451 = arith.mulf %450, %449 : vector<16x16xf32>
    %452 = arith.addf %446, %451 : vector<16x16xf32>
    %c73 = arith.constant 73 : index
    %453 = memref.load %arg1[%c73] : memref<98xf32, #tpu.memory_space<smem>>
    %c1_236 = arith.constant 1 : index
    %c3_237 = arith.constant 3 : index
    %c3_238 = arith.constant 3 : index
    %454 = vector.load %arg4[%c1_236, %c3_237, %c3_238] : memref<2x22x22xf32, #tpu.memory_space<vmem>>, vector<1x16x16xf32>
    %455 = vector.shape_cast %454 : vector<1x16x16xf32> to vector<16x16xf32>
    %456 = vector.broadcast %453 : f32 to vector<16x16xf32>
    %457 = arith.mulf %456, %455 : vector<16x16xf32>
    %458 = arith.addf %452, %457 : vector<16x16xf32>
    %c74 = arith.constant 74 : index
    %459 = memref.load %arg1[%c74] : memref<98xf32, #tpu.memory_space<smem>>
    %c1_239 = arith.constant 1 : index
    %c3_240 = arith.constant 3 : index
    %c4_241 = arith.constant 4 : index
    %460 = vector.load %arg4[%c1_239, %c3_240, %c4_241] : memref<2x22x22xf32, #tpu.memory_space<vmem>>, vector<1x16x16xf32>
    %461 = vector.shape_cast %460 : vector<1x16x16xf32> to vector<16x16xf32>
    %462 = vector.broadcast %459 : f32 to vector<16x16xf32>
    %463 = arith.mulf %462, %461 : vector<16x16xf32>
    %464 = arith.addf %458, %463 : vector<16x16xf32>
    %c75 = arith.constant 75 : index
    %465 = memref.load %arg1[%c75] : memref<98xf32, #tpu.memory_space<smem>>
    %c1_242 = arith.constant 1 : index
    %c3_243 = arith.constant 3 : index
    %c5_244 = arith.constant 5 : index
    %466 = vector.load %arg4[%c1_242, %c3_243, %c5_244] : memref<2x22x22xf32, #tpu.memory_space<vmem>>, vector<1x16x16xf32>
    %467 = vector.shape_cast %466 : vector<1x16x16xf32> to vector<16x16xf32>
    %468 = vector.broadcast %465 : f32 to vector<16x16xf32>
    %469 = arith.mulf %468, %467 : vector<16x16xf32>
    %470 = arith.addf %464, %469 : vector<16x16xf32>
    %c76 = arith.constant 76 : index
    %471 = memref.load %arg1[%c76] : memref<98xf32, #tpu.memory_space<smem>>
    %c1_245 = arith.constant 1 : index
    %c3_246 = arith.constant 3 : index
    %c6_247 = arith.constant 6 : index
    %472 = vector.load %arg4[%c1_245, %c3_246, %c6_247] : memref<2x22x22xf32, #tpu.memory_space<vmem>>, vector<1x16x16xf32>
    %473 = vector.shape_cast %472 : vector<1x16x16xf32> to vector<16x16xf32>
    %474 = vector.broadcast %471 : f32 to vector<16x16xf32>
    %475 = arith.mulf %474, %473 : vector<16x16xf32>
    %476 = arith.addf %470, %475 : vector<16x16xf32>
    %c77 = arith.constant 77 : index
    %477 = memref.load %arg1[%c77] : memref<98xf32, #tpu.memory_space<smem>>
    %c1_248 = arith.constant 1 : index
    %c4_249 = arith.constant 4 : index
    %c0_250 = arith.constant 0 : index
    %478 = vector.load %arg4[%c1_248, %c4_249, %c0_250] : memref<2x22x22xf32, #tpu.memory_space<vmem>>, vector<1x16x16xf32>
    %479 = vector.shape_cast %478 : vector<1x16x16xf32> to vector<16x16xf32>
    %480 = vector.broadcast %477 : f32 to vector<16x16xf32>
    %481 = arith.mulf %480, %479 : vector<16x16xf32>
    %482 = arith.addf %476, %481 : vector<16x16xf32>
    %c78 = arith.constant 78 : index
    %483 = memref.load %arg1[%c78] : memref<98xf32, #tpu.memory_space<smem>>
    %c1_251 = arith.constant 1 : index
    %c4_252 = arith.constant 4 : index
    %c1_253 = arith.constant 1 : index
    %484 = vector.load %arg4[%c1_251, %c4_252, %c1_253] : memref<2x22x22xf32, #tpu.memory_space<vmem>>, vector<1x16x16xf32>
    %485 = vector.shape_cast %484 : vector<1x16x16xf32> to vector<16x16xf32>
    %486 = vector.broadcast %483 : f32 to vector<16x16xf32>
    %487 = arith.mulf %486, %485 : vector<16x16xf32>
    %488 = arith.addf %482, %487 : vector<16x16xf32>
    %c79 = arith.constant 79 : index
    %489 = memref.load %arg1[%c79] : memref<98xf32, #tpu.memory_space<smem>>
    %c1_254 = arith.constant 1 : index
    %c4_255 = arith.constant 4 : index
    %c2_256 = arith.constant 2 : index
    %490 = vector.load %arg4[%c1_254, %c4_255, %c2_256] : memref<2x22x22xf32, #tpu.memory_space<vmem>>, vector<1x16x16xf32>
    %491 = vector.shape_cast %490 : vector<1x16x16xf32> to vector<16x16xf32>
    %492 = vector.broadcast %489 : f32 to vector<16x16xf32>
    %493 = arith.mulf %492, %491 : vector<16x16xf32>
    %494 = arith.addf %488, %493 : vector<16x16xf32>
    %c80 = arith.constant 80 : index
    %495 = memref.load %arg1[%c80] : memref<98xf32, #tpu.memory_space<smem>>
    %c1_257 = arith.constant 1 : index
    %c4_258 = arith.constant 4 : index
    %c3_259 = arith.constant 3 : index
    %496 = vector.load %arg4[%c1_257, %c4_258, %c3_259] : memref<2x22x22xf32, #tpu.memory_space<vmem>>, vector<1x16x16xf32>
    %497 = vector.shape_cast %496 : vector<1x16x16xf32> to vector<16x16xf32>
    %498 = vector.broadcast %495 : f32 to vector<16x16xf32>
    %499 = arith.mulf %498, %497 : vector<16x16xf32>
    %500 = arith.addf %494, %499 : vector<16x16xf32>
    %c81 = arith.constant 81 : index
    %501 = memref.load %arg1[%c81] : memref<98xf32, #tpu.memory_space<smem>>
    %c1_260 = arith.constant 1 : index
    %c4_261 = arith.constant 4 : index
    %c4_262 = arith.constant 4 : index
    %502 = vector.load %arg4[%c1_260, %c4_261, %c4_262] : memref<2x22x22xf32, #tpu.memory_space<vmem>>, vector<1x16x16xf32>
    %503 = vector.shape_cast %502 : vector<1x16x16xf32> to vector<16x16xf32>
    %504 = vector.broadcast %501 : f32 to vector<16x16xf32>
    %505 = arith.mulf %504, %503 : vector<16x16xf32>
    %506 = arith.addf %500, %505 : vector<16x16xf32>
    %c82 = arith.constant 82 : index
    %507 = memref.load %arg1[%c82] : memref<98xf32, #tpu.memory_space<smem>>
    %c1_263 = arith.constant 1 : index
    %c4_264 = arith.constant 4 : index
    %c5_265 = arith.constant 5 : index
    %508 = vector.load %arg4[%c1_263, %c4_264, %c5_265] : memref<2x22x22xf32, #tpu.memory_space<vmem>>, vector<1x16x16xf32>
    %509 = vector.shape_cast %508 : vector<1x16x16xf32> to vector<16x16xf32>
    %510 = vector.broadcast %507 : f32 to vector<16x16xf32>
    %511 = arith.mulf %510, %509 : vector<16x16xf32>
    %512 = arith.addf %506, %511 : vector<16x16xf32>
    %c83 = arith.constant 83 : index
    %513 = memref.load %arg1[%c83] : memref<98xf32, #tpu.memory_space<smem>>
    %c1_266 = arith.constant 1 : index
    %c4_267 = arith.constant 4 : index
    %c6_268 = arith.constant 6 : index
    %514 = vector.load %arg4[%c1_266, %c4_267, %c6_268] : memref<2x22x22xf32, #tpu.memory_space<vmem>>, vector<1x16x16xf32>
    %515 = vector.shape_cast %514 : vector<1x16x16xf32> to vector<16x16xf32>
    %516 = vector.broadcast %513 : f32 to vector<16x16xf32>
    %517 = arith.mulf %516, %515 : vector<16x16xf32>
    %518 = arith.addf %512, %517 : vector<16x16xf32>
    %c84 = arith.constant 84 : index
    %519 = memref.load %arg1[%c84] : memref<98xf32, #tpu.memory_space<smem>>
    %c1_269 = arith.constant 1 : index
    %c5_270 = arith.constant 5 : index
    %c0_271 = arith.constant 0 : index
    %520 = vector.load %arg4[%c1_269, %c5_270, %c0_271] : memref<2x22x22xf32, #tpu.memory_space<vmem>>, vector<1x16x16xf32>
    %521 = vector.shape_cast %520 : vector<1x16x16xf32> to vector<16x16xf32>
    %522 = vector.broadcast %519 : f32 to vector<16x16xf32>
    %523 = arith.mulf %522, %521 : vector<16x16xf32>
    %524 = arith.addf %518, %523 : vector<16x16xf32>
    %c85 = arith.constant 85 : index
    %525 = memref.load %arg1[%c85] : memref<98xf32, #tpu.memory_space<smem>>
    %c1_272 = arith.constant 1 : index
    %c5_273 = arith.constant 5 : index
    %c1_274 = arith.constant 1 : index
    %526 = vector.load %arg4[%c1_272, %c5_273, %c1_274] : memref<2x22x22xf32, #tpu.memory_space<vmem>>, vector<1x16x16xf32>
    %527 = vector.shape_cast %526 : vector<1x16x16xf32> to vector<16x16xf32>
    %528 = vector.broadcast %525 : f32 to vector<16x16xf32>
    %529 = arith.mulf %528, %527 : vector<16x16xf32>
    %530 = arith.addf %524, %529 : vector<16x16xf32>
    %c86 = arith.constant 86 : index
    %531 = memref.load %arg1[%c86] : memref<98xf32, #tpu.memory_space<smem>>
    %c1_275 = arith.constant 1 : index
    %c5_276 = arith.constant 5 : index
    %c2_277 = arith.constant 2 : index
    %532 = vector.load %arg4[%c1_275, %c5_276, %c2_277] : memref<2x22x22xf32, #tpu.memory_space<vmem>>, vector<1x16x16xf32>
    %533 = vector.shape_cast %532 : vector<1x16x16xf32> to vector<16x16xf32>
    %534 = vector.broadcast %531 : f32 to vector<16x16xf32>
    %535 = arith.mulf %534, %533 : vector<16x16xf32>
    %536 = arith.addf %530, %535 : vector<16x16xf32>
    %c87 = arith.constant 87 : index
    %537 = memref.load %arg1[%c87] : memref<98xf32, #tpu.memory_space<smem>>
    %c1_278 = arith.constant 1 : index
    %c5_279 = arith.constant 5 : index
    %c3_280 = arith.constant 3 : index
    %538 = vector.load %arg4[%c1_278, %c5_279, %c3_280] : memref<2x22x22xf32, #tpu.memory_space<vmem>>, vector<1x16x16xf32>
    %539 = vector.shape_cast %538 : vector<1x16x16xf32> to vector<16x16xf32>
    %540 = vector.broadcast %537 : f32 to vector<16x16xf32>
    %541 = arith.mulf %540, %539 : vector<16x16xf32>
    %542 = arith.addf %536, %541 : vector<16x16xf32>
    %c88 = arith.constant 88 : index
    %543 = memref.load %arg1[%c88] : memref<98xf32, #tpu.memory_space<smem>>
    %c1_281 = arith.constant 1 : index
    %c5_282 = arith.constant 5 : index
    %c4_283 = arith.constant 4 : index
    %544 = vector.load %arg4[%c1_281, %c5_282, %c4_283] : memref<2x22x22xf32, #tpu.memory_space<vmem>>, vector<1x16x16xf32>
    %545 = vector.shape_cast %544 : vector<1x16x16xf32> to vector<16x16xf32>
    %546 = vector.broadcast %543 : f32 to vector<16x16xf32>
    %547 = arith.mulf %546, %545 : vector<16x16xf32>
    %548 = arith.addf %542, %547 : vector<16x16xf32>
    %c89 = arith.constant 89 : index
    %549 = memref.load %arg1[%c89] : memref<98xf32, #tpu.memory_space<smem>>
    %c1_284 = arith.constant 1 : index
    %c5_285 = arith.constant 5 : index
    %c5_286 = arith.constant 5 : index
    %550 = vector.load %arg4[%c1_284, %c5_285, %c5_286] : memref<2x22x22xf32, #tpu.memory_space<vmem>>, vector<1x16x16xf32>
    %551 = vector.shape_cast %550 : vector<1x16x16xf32> to vector<16x16xf32>
    %552 = vector.broadcast %549 : f32 to vector<16x16xf32>
    %553 = arith.mulf %552, %551 : vector<16x16xf32>
    %554 = arith.addf %548, %553 : vector<16x16xf32>
    %c90 = arith.constant 90 : index
    %555 = memref.load %arg1[%c90] : memref<98xf32, #tpu.memory_space<smem>>
    %c1_287 = arith.constant 1 : index
    %c5_288 = arith.constant 5 : index
    %c6_289 = arith.constant 6 : index
    %556 = vector.load %arg4[%c1_287, %c5_288, %c6_289] : memref<2x22x22xf32, #tpu.memory_space<vmem>>, vector<1x16x16xf32>
    %557 = vector.shape_cast %556 : vector<1x16x16xf32> to vector<16x16xf32>
    %558 = vector.broadcast %555 : f32 to vector<16x16xf32>
    %559 = arith.mulf %558, %557 : vector<16x16xf32>
    %560 = arith.addf %554, %559 : vector<16x16xf32>
    %c91 = arith.constant 91 : index
    %561 = memref.load %arg1[%c91] : memref<98xf32, #tpu.memory_space<smem>>
    %c1_290 = arith.constant 1 : index
    %c6_291 = arith.constant 6 : index
    %c0_292 = arith.constant 0 : index
    %562 = vector.load %arg4[%c1_290, %c6_291, %c0_292] : memref<2x22x22xf32, #tpu.memory_space<vmem>>, vector<1x16x16xf32>
    %563 = vector.shape_cast %562 : vector<1x16x16xf32> to vector<16x16xf32>
    %564 = vector.broadcast %561 : f32 to vector<16x16xf32>
    %565 = arith.mulf %564, %563 : vector<16x16xf32>
    %566 = arith.addf %560, %565 : vector<16x16xf32>
    %c92 = arith.constant 92 : index
    %567 = memref.load %arg1[%c92] : memref<98xf32, #tpu.memory_space<smem>>
    %c1_293 = arith.constant 1 : index
    %c6_294 = arith.constant 6 : index
    %c1_295 = arith.constant 1 : index
    %568 = vector.load %arg4[%c1_293, %c6_294, %c1_295] : memref<2x22x22xf32, #tpu.memory_space<vmem>>, vector<1x16x16xf32>
    %569 = vector.shape_cast %568 : vector<1x16x16xf32> to vector<16x16xf32>
    %570 = vector.broadcast %567 : f32 to vector<16x16xf32>
    %571 = arith.mulf %570, %569 : vector<16x16xf32>
    %572 = arith.addf %566, %571 : vector<16x16xf32>
    %c93 = arith.constant 93 : index
    %573 = memref.load %arg1[%c93] : memref<98xf32, #tpu.memory_space<smem>>
    %c1_296 = arith.constant 1 : index
    %c6_297 = arith.constant 6 : index
    %c2_298 = arith.constant 2 : index
    %574 = vector.load %arg4[%c1_296, %c6_297, %c2_298] : memref<2x22x22xf32, #tpu.memory_space<vmem>>, vector<1x16x16xf32>
    %575 = vector.shape_cast %574 : vector<1x16x16xf32> to vector<16x16xf32>
    %576 = vector.broadcast %573 : f32 to vector<16x16xf32>
    %577 = arith.mulf %576, %575 : vector<16x16xf32>
    %578 = arith.addf %572, %577 : vector<16x16xf32>
    %c94 = arith.constant 94 : index
    %579 = memref.load %arg1[%c94] : memref<98xf32, #tpu.memory_space<smem>>
    %c1_299 = arith.constant 1 : index
    %c6_300 = arith.constant 6 : index
    %c3_301 = arith.constant 3 : index
    %580 = vector.load %arg4[%c1_299, %c6_300, %c3_301] : memref<2x22x22xf32, #tpu.memory_space<vmem>>, vector<1x16x16xf32>
    %581 = vector.shape_cast %580 : vector<1x16x16xf32> to vector<16x16xf32>
    %582 = vector.broadcast %579 : f32 to vector<16x16xf32>
    %583 = arith.mulf %582, %581 : vector<16x16xf32>
    %584 = arith.addf %578, %583 : vector<16x16xf32>
    %c95 = arith.constant 95 : index
    %585 = memref.load %arg1[%c95] : memref<98xf32, #tpu.memory_space<smem>>
    %c1_302 = arith.constant 1 : index
    %c6_303 = arith.constant 6 : index
    %c4_304 = arith.constant 4 : index
    %586 = vector.load %arg4[%c1_302, %c6_303, %c4_304] : memref<2x22x22xf32, #tpu.memory_space<vmem>>, vector<1x16x16xf32>
    %587 = vector.shape_cast %586 : vector<1x16x16xf32> to vector<16x16xf32>
    %588 = vector.broadcast %585 : f32 to vector<16x16xf32>
    %589 = arith.mulf %588, %587 : vector<16x16xf32>
    %590 = arith.addf %584, %589 : vector<16x16xf32>
    %c96 = arith.constant 96 : index
    %591 = memref.load %arg1[%c96] : memref<98xf32, #tpu.memory_space<smem>>
    %c1_305 = arith.constant 1 : index
    %c6_306 = arith.constant 6 : index
    %c5_307 = arith.constant 5 : index
    %592 = vector.load %arg4[%c1_305, %c6_306, %c5_307] : memref<2x22x22xf32, #tpu.memory_space<vmem>>, vector<1x16x16xf32>
    %593 = vector.shape_cast %592 : vector<1x16x16xf32> to vector<16x16xf32>
    %594 = vector.broadcast %591 : f32 to vector<16x16xf32>
    %595 = arith.mulf %594, %593 : vector<16x16xf32>
    %596 = arith.addf %590, %595 : vector<16x16xf32>
    %c97 = arith.constant 97 : index
    %597 = memref.load %arg1[%c97] : memref<98xf32, #tpu.memory_space<smem>>
    %c1_308 = arith.constant 1 : index
    %c6_309 = arith.constant 6 : index
    %c6_310 = arith.constant 6 : index
    %598 = vector.load %arg4[%c1_308, %c6_309, %c6_310] : memref<2x22x22xf32, #tpu.memory_space<vmem>>, vector<1x16x16xf32>
    %599 = vector.shape_cast %598 : vector<1x16x16xf32> to vector<16x16xf32>
    %600 = vector.broadcast %597 : f32 to vector<16x16xf32>
    %601 = arith.mulf %600, %599 : vector<16x16xf32>
    %602 = arith.addf %596, %601 : vector<16x16xf32>
    %cst_311 = arith.constant 0.000000e+00 : f32
    %603 = vector.broadcast %cst_311 : f32 to vector<16x16xf32>
    %604 = arith.subf %603, %602 : vector<16x16xf32>
    %605 = math.exp %604 : vector<16x16xf32>
    %cst_312 = arith.constant 1.000000e+00 : f32
    %606 = vector.broadcast %cst_312 : f32 to vector<16x16xf32>
    %607 = arith.addf %606, %605 : vector<16x16xf32>
    %cst_313 = arith.constant 1.000000e+00 : f32
    %608 = vector.broadcast %cst_313 : f32 to vector<16x16xf32>
    %609 = arith.divf %608, %607 : vector<16x16xf32>
    %610 = vector.shape_cast %609 : vector<16x16xf32> to vector<1x16x16xf32>
    %611 = vector.broadcast %610 : vector<1x16x16xf32> to vector<4x16x16xf32>
    %612 = arith.mulf %1, %611 : vector<4x16x16xf32>
    %c0_314 = arith.constant 0 : index
    %c0_315 = arith.constant 0 : index
    %c0_316 = arith.constant 0 : index
    %c0_317 = arith.constant 0 : index
    %613 = vector.load %arg3[%c0_314, %c0_315, %c0_316, %c0_317] : memref<1x4x16x16xf32, #tpu.memory_space<vmem>>, vector<1x4x16x16xf32>
    %614 = vector.shape_cast %613 : vector<1x4x16x16xf32> to vector<4x16x16xf32>
    %615 = vector.shape_cast %612 : vector<4x16x16xf32> to vector<1x4x16x16xf32>
    tpu.vector_store %arg3[%c0_314, %c0_315, %c0_316, %c0_317], %615 {strides = array<i32>} : memref<1x4x16x16xf32, #tpu.memory_space<vmem>>, vector<1x4x16x16xf32>,
    return
  }
  func.func @transform_0(%arg0: i32) -> i32 {
    %c0_i32 = arith.constant 0 : i32
    %c0_i32_0 = arith.constant 0 : i32
    return %c0_i32 : i32
  }
  func.func @transform_1(%arg0: i32) -> (i32, i32, i32, i32) {
    %c0_i32 = arith.constant 0 : i32
    %c0_i32_0 = arith.constant 0 : i32
    %c0_i32_1 = arith.constant 0 : i32
    %c0_i32_2 = arith.constant 0 : i32
    return %arg0, %c0_i32, %c0_i32_0, %c0_i32_1 : i32, i32, i32, i32
  }
  func.func @transform_2(%arg0: i32) -> (i32, i32, i32, i32) {
    %c0_i32 = arith.constant 0 : i32
    %c0_i32_0 = arith.constant 0 : i32
    %c0_i32_1 = arith.constant 0 : i32
    %c0_i32_2 = arith.constant 0 : i32
    return %arg0, %c0_i32, %c0_i32_0, %c0_i32_1 : i32, i32, i32, i32
  }
}

</mosaic_0001>

<bundles_post_ra>
// kernel: tpu_custom_call.1
= control target key start
LH: loop header
LB: loop body
LE: loop exit
PB: predicated region body
PF: predicated region fallthrough
CT: control target
= control target key end

     0   :  { %7 = vsyncpa [#allocation6], 0  ;;  %s2872_s0 = inlined_call_operand.hbm [shape: f32[98], index: 0, kind: input, shape index: {}]   ;;  %s2873_s1 = inlined_call_operand.hbm [shape: f32[2,4,16,16], index: 1, kind: input, shape index: {}]   ;;  %s2874_s2 = inlined_call_operand.hbm [shape: f32[2,4,16,16], index: 2, kind: output, shape index: {}]  }
   0x1   :  { %8 = vsyncpa [#allocation4], 0 }
   0x2   :  { %10 = vsyncpa [#allocation4 + $0x1], 0 }
   0x3   :  { %11 = vsyncpa [#allocation5], 0 }
   0x4   :  { %13 = vsyncpa [#allocation5 + $0x1], 0  ;;  %s2046_s9 = smov 0   ;;  %s2048_s10 = smov 0  }
   0x5   :  { %s2050_s11 = smov 0   ;;  %s2052_s12 = smov 0  }
   0x6 LB: > { %s2067_s13 = sadd.s32 4294967295, %s2015_s12   ;;  %s1697_s14 = sadd.s32 4294967294, %s2015_s12   ;;  %s2015_s12 = sphi %s2052_s12, %s2885_s12   ;;  %s2011_s11 = sphi %s2050_s11, %s2884_s11   ;;  %s2007_s10 = sphi %s2048_s10, %s2883_s10   ;;  %s2003_s9 = sphi %s2046_s9, %s2882_s9  }
   0x7   : > { %s2071_s15 = sadd.s32 1, %s2015_s12   ;;  %s47_s16 = sadd.s32 1, %s2011_s11 }
   0x8   : > { %s44_s17 = ssub.s32 %s2015_s12, %s2071_s15  ;;  %p54_p0 = scmp.ne.s32.totalorder %s2011_s11, %s2007_s10 }
   0x9   : > { %p45_p1 = scmp.eq.s32.totalorder %s44_s17, 0  ;;  %p55_p2 = scmp.eq.s32.totalorder %s2015_s12, 0 }
   0xa   : > { %p60_p3 = scmp.ne.s32.totalorder %s2007_s10, %s2003_s9  ;;  %p61_p4 = scmp.eq.s32.totalorder %s2067_s13, 0 }
   0xb   : > { %s2083_s18 = scalar_select %p45_p1, %s2011_s11, %s47_s16  }
   0xc   : > { %p2085_p5 = por %p55_p2, %p54_p0  ;;  %p2091_p6 = por %p61_p4, %p60_p3 }
   0xd   : > { %p84_p7 = scmp.eq.s32.totalorder %s2067_s13, 1  ;;  %p90_p8 = scmp.eq.s32.totalorder %s1697_s14, 1 }
   0xe   : > { %p1698_p9 = scmp.ge.s32.totalorder %s2015_s12, 1  ;;  %p97_p10 = scmp.lt.s32.totalorder %s2015_s12, 3 }
   0xf   : > { %p2098_p11 = por %p84_p7, %p54_p0  ;;  %p2102_p12 = por %p90_p8, %p60_p3 }
  0x10   : > { %p2106_p13 = pnand %p1698_p9, %p97_p10  ;;  %s109_s26 = sshll.u32 %s2872_s0, 4  ;;  %s110_s26 = int_to_ptr.hbm [resolvable:$true] %s109_s26 }
  0x11   : > { %p1833_p2 = scmp.lt.s32.totalorder %s2015_s12, 2  ;;  %s120_s27 = sand.u32 1, %s2011_s11  }
  0x12   : > { %p1820_p1 = pneg %p2106_p13  ;;  %s1701_s29 = sshll.u32 %s120_s27, 6 }
  0x13   : > { %p2122_p3 = pnand %p1833_p2, %p2085_p5  ;;  %s2017_s30 = smov [#allocation3]  }
  0x14   : > { %p1821_p7 = pnand %p1820_p1, %p61_p4  ;;  %s1810_s3 = sshll.u32 %s2015_s12, 6 }
  0x15   : > { %s124_s4 = scalar_lea.vmem [#allocation7], %s1701_s29  ;;  %s129_s8 = scalar_lea.hbm %s2873_s1, %s1810_s3 }
  0x16   : > { %1823 = dma.hbm_to_smem (!%p1821_p7), %s110_s26, 16, %s2017_s30, [#allocation6]  }
  0x17   : > { %s132_s5 = sshll.u32 %s124_s4, 4  ;;  %s130_s14 = sshll.u32 %s129_s8, 4  ;;  %s133_s5 = int_to_ptr.vmem [resolvable:$true] %s132_s5  ;;  %s131_s14 = int_to_ptr.hbm [resolvable:$true] %s130_s14 }
  0x18   : > { %s121_s16 = scalar_lea.sflag [#allocation4], %s120_s27  ;;  %s1915_s17 = sshra.s32 %s131_s14, 4  ;;  %s1916_s17 = int_to_ptr.hbm [resolvable:$true] %s1915_s17 }
  0x19   : > { %s1917_s19 = scalar_lea.hbm %s1916_s17, 64  ;;  %p1919_p8 = pneg %p2122_p3 }
  0x1a   : > { %p1918_p5 = scmp.ne.s32.totalorder %s1916_s17, %s1917_s19  ;;  %s1922_s26 = scalar_lea.hbm %s2873_s1, 128 }
  0x1b   : > { %p1923_p1 = scmp.lt.s32.totalorder %s1916_s17, %s2873_s1  ;;  %p1924_p2 = scmp.lt.s32.totalorder %s1922_s26, %s1917_s19 }
  0x1c   : > { %p1920_p9 = pnand %p1919_p8, %p1918_p5 }
  0x1d   : > { %p1925_p7 = por %p1924_p2, %p1923_p1 }
  0x1e   : > { %p1921_p10 = pneg %p1920_p9 }
  0x20   : > { %p1926_p0 = pnand %p1925_p7, %p1921_p10 }
  0x22   : > { %1929 = shalt.err (!%p1926_p0)
}
  0x23   : > { %s2018_s27 = smov 128   ;;  %s2019_s3 = smov 8  }
  0x24   : > { %1827 = dma.hbm_to_vmem [thread:$0]  (!%p2122_p3), %s131_s14, 1024, %s133_s5, %s121_s16, %s2018_s27, %s2018_s27, %s2019_s3  }
  0x25   : > { %144 = sbr.rel (%p2106_p13) target bundleno = 792 (0x318), region = 28 }
  0x2a   : > { %1990 = dma.done.wait (%p61_p4), [#allocation6], 16  }
  0x2b   : > { %1992 = vsyncadd (%p61_p4), [#allocation6], 4294967280  ;;  %s2147_s4 = sand.u32 1, %s2007_s10  }
  0x2c   : > { %s1706_s6 = sshll.u32 %s2147_s4, 6  ;;  %s152_s7 = scalar_lea.sflag [#allocation4], %s2147_s4 }
  0x2d   : > { %s2153_s28 = scalar_lea.vmem [#allocation7], %s1706_s6 }
  0x2e   : > { %1994 = dma.done.wait (%p2091_p6), %s152_s7, 1024  }
  0x2f   : > { %1996 = vsyncadd (%p2091_p6), %s152_s7, 4294966272 }
  0x30   : > { %161 = sfence }
  0x31   : > { %v178_v0 = vld [vmem:[%s2153_s28] sm:$0xff]  ;;  %v180_v1 = vld [vmem:[%s2153_s28 + $0x10] sm:$0xff]  ;;  %vm186_vm0 = vcmask 130048   ;;  %v2020_v2 = vmov 4.0   ;;  %v179_v11 = vld [vmem:[%s2153_s28 + $0x8] sm:$0xff]  ;;  %vm224_vm1 = vcmask 179200  }
  0x32   : > { %1882 = vrcp.f32 %v2020_v2  ;;  %v187_v3 = vsel %vm186_vm0, %v178_v0, 0.0  ;;  %v188_v4 = vsel %vm186_vm0, %v180_v1, 0.0  ;;  %v182_v5 = vld [vmem:[%s2153_s28 + $0x20] sm:$0xff]  ;;  %v184_v6 = vld [vmem:[%s2153_s28 + $0x30] sm:$0xff]  ;;  %v210_v7 = vsel %vm186_vm0, %v178_v0, -inf  ;;  %v181_v12 = vld [vmem:[%s2153_s28 + $0x18] sm:$0xff] }
  0x33   : > { %v211_v8 = vsel %vm186_vm0, %v180_v1, -inf  ;;  %v212_v9 = vsel %vm186_vm0, %v182_v5, -inf  ;;  %v214_v10 = vsel %vm186_vm0, %v184_v6, -inf  ;;  %v189_v13 = vadd.f32 %v188_v4, %v187_v3  ;;  %v183_v23 = vld [vmem:[%s2153_s28 + $0x28] sm:$0xff]  ;;  %s2022_s20 = smov 3   ;;  %v185_v30 = vld [vmem:[%s2153_s28 + $0x38] sm:$0xff] }
  0x34   : > { %v213_v14 = vmax.f32 %v210_v7, %v212_v9  ;;  %v215_v15 = vmax.f32 %v211_v8, %v214_v10  ;;  %v190_v16 = vsel %vm186_vm0, %v182_v5, 0.0  ;;  %v2021_v19 = vmov 0.0   ;;  %s1709_s23 = sld [smem:[#allocation3 + $0x2]]  ;;  %s2023_s14 = smov 126  }
  0x35   : > { %225 = vst.msk [vmem:[#allocation2] sm:$0xff] %vm224_vm1, %v2021_v19  ;;  %v194_v20 = vsel %vm186_vm0, %v179_v11, 0.0  ;;  %v195_v21 = vsel %vm186_vm0, %v181_v12, 0.0  ;;  %v191_v24 = vadd.f32 %v190_v16, %v189_v13  ;;  %v192_v25 = vsel %vm186_vm0, %v184_v6, 0.0  ;;  %s1708_s5 = sld [smem:[#allocation3 + $0x1]]  ;;  %s2024_s16 = smov 127  }
  0x36   : > { %v216_v18 = vmax.f32 %v213_v14, %v215_v15  ;;  %226 = vst.msk [vmem:[#allocation2 + $0x8] sm:$0xff] %vm224_vm1, %v2021_v19  ;;  %v196_v27 = vadd.f32 %v195_v21, %v194_v20  ;;  %v197_v28 = vsel %vm186_vm0, %v183_v23, 0.0  ;;  %v199_v34 = vsel %vm186_vm0, %v185_v30, 0.0  ;;  %s1710_s8 = sld [smem:[#allocation3 + $0x3]]  ;;  %s2025_s24 = smov 125  }
  0x37   : > { %229 = vst.msk [vmem:[#allocation2 + $0x18] sm:$0xff] %vm224_vm1, %v2021_v19  ;;  %v193_v31 = vadd.f32 %v192_v25, %v191_v24  ;;  %v217_v39 = vsel %vm186_vm0, %v179_v11, -inf  ;;  %v218_v40 = vsel %vm186_vm0, %v181_v12, -inf  ;;  %v219_v41 = vsel %vm186_vm0, %v183_v23, -inf  ;;  %s1712_s17 = sld [smem:[#allocation3 + $0x5]]  ;;  %s2026_s26 = smov 123  }
  0x38   : > { %v1883_v17 = vpop.eup %1882  ;;  %245 = vrot.lane.b32.xlu1 %v216_v18, %s2022_s20  ;;  %230 = vst.msk [vmem:[#allocation2 + $0x20] sm:$0xff] %vm224_vm1, %v2021_v19  ;;  %v198_v33 = vadd.f32 %v197_v28, %v196_v27  ;;  %v221_v42 = vsel %vm186_vm0, %v185_v30, -inf  ;;  %v220_v43 = vmax.f32 %v217_v39, %v219_v41  ;;  %vm227_vm3 = vcmask 177152   ;;  %s1711_s19 = sld [smem:[#allocation3 + $0x4]]  ;;  %s2027_s29 = smov 124  }
  0x39   : > { %v202_v22 = vmul.f32 4.0, %v1883_v17  ;;  %vm206_vm2 = vweird.f32 %v1883_v17  ;;  %v222_v44 = vmax.f32 %v218_v40, %v221_v42  ;;  %228 = vst.msk [vmem:[#allocation2 + $0x10] sm:$0x3f] %vm227_vm3, %v2021_v19  ;;  %vm240_vm4 = vcmask 154648   ;;  %s1713_s25 = sld [smem:[#allocation3 + $0x6]]  ;;  %s2028_s3 = smov 122  }
  0x3a   : > { %v200_v37 = vadd.f32 %v199_v34, %v198_v33  ;;  %231 = vst.msk [vmem:[#allocation2 + $0x28] sm:$0x3f] %vm227_vm3, %v2021_v19  ;;  %v277_v47 = vstv %s1709_s23  ;;  %s1716_s30 = sld [smem:[#allocation3 + $0x9]] }
  0x3b   : > { %v203_v26 = vsub.f32 1.0, %v202_v22  ;;  %v223_v45 = vmax.f32 %v220_v43, %v222_v44  ;;  %v263_v48 = vstv %s1708_s5  ;;  %s1715_s27 = sld [smem:[#allocation3 + $0x8]] }
  0x3c   : > { %v291_v55 = vstv %s1710_s8  ;;  %s1717_s7 = sld [smem:[#allocation3 + $0xa]] }
  0x3d   : > { %v204_v29 = vmul.f32 %v1883_v17, %v203_v26  ;;  %v319_v58 = vstv %s1712_s17  ;;  %s1718_s23 = sld [smem:[#allocation3 + $0xb]] }
  0x3e   : > { %v305_v59 = vstv %s1711_s19  ;;  %s1720_s5 = sld [smem:[#allocation3 + $0xd]] }
  0x3f   : > { %v205_v32 = vadd.f32 %v1883_v17, %v204_v29  ;;  %v333_v63 = vstv %s1713_s25  ;;  %s1723_s8 = sld [smem:[#allocation3 + $0x10]] }
  0x40   : > { %247 = vrot.lane.b32.xlu1 %v223_v45, %s2022_s20  ;;  %v369_v4 = vstv %s1716_s30  ;;  %s1722_s17 = sld [smem:[#allocation3 + $0xf]] }
  0x41   : > { %v207_v35 = vsel %vm206_vm2, %v1883_v17, %v205_v32  ;;  %v355_v5 = vstv %s1715_s27  ;;  %s1724_s19 = sld [smem:[#allocation3 + $0x11]] }
  0x42   : > { %v208_v36 = vmul.f32 %v207_v35, %v193_v31  ;;  %v209_v38 = vmul.f32 %v207_v35, %v200_v37  ;;  %v383_v10 = vstv %s1717_s7  ;;  %s1726_s25 = sld [smem:[#allocation3 + $0x13]] }
  0x43   : > { %v397_v15 = vstv %s1718_s23  ;;  %s1725_s30 = sld [smem:[#allocation3 + $0x12]] }
  0x44   : > { %234 = vrot.lane.b32.xlu0 %v208_v36, %s2022_s20  ;;  %v425_v19 = vstv %s1720_s5  ;;  %s1727_s27 = sld [smem:[#allocation3 + $0x14]] }
  0x45   : > { %v461_v24 = vstv %s1723_s8  ;;  %s1730_s7 = sld [smem:[#allocation3 + $0x17]] }
  0x46   : > { %v447_v25 = vstv %s1722_s17  ;;  %s1731_s23 = sld [smem:[#allocation3 + $0x18]] }
  0x47   : > { %v475_v31 = vstv %s1724_s19  ;;  %s1733_s5 = sld [smem:[#allocation3 + $0x1a]] }
  0x48   : > { %v503_v36 = vstv %s1726_s25  ;;  %s1732_s8 = sld [smem:[#allocation3 + $0x19]] }
  0x49   : > { %v489_v37 = vstv %s1725_s30  ;;  %s2289_s17 = sld [smem:[#allocation3 + $0x1b]] }
  0x4a   : > { %v517_v41 = vstv %s1727_s27  ;;  %s254_s19 = sld [smem:[#allocation3]] }
  0x4b   : > { %s2297_s25 = sld [smem:[#allocation3 + $0x1e]] }
  0x4c   : > { %236 = vrot.lane.b32.xlu0 %v209_v38, %s2022_s20  ;;  %s1719_s20 = sld [smem:[#allocation3 + $0xc]] }
  0x4d   : > { %s2299_s30 = sld [smem:[#allocation3 + $0x1d]] }
  0x4e   : > { %s2313_s27 = sld [smem:[#allocation3 + $0x1f]] }
  0x52   : > { %v411_v14 = vstv %s1719_s20  ;;  %s1729_s20 = sld [smem:[#allocation3 + $0x16]] }
  0xaa   : > { %v246_v29 = vpop.permute.xlu1 %245 }
  0xab   : > { %252 = vst.msk [vmem:[#allocation2 + $0x1b] sm:$0xff] %vm240_vm4, %v246_v29 }
  0xb2   : > { %v248_v35 = vpop.permute.xlu1 %247 }
  0xb3   : > { %253 = vst.msk [vmem:[#allocation2 + $0x23] sm:$0xff] %vm240_vm4, %v248_v35 }
  0xb6   : > { %v235_v46 = vpop.permute.xlu0 %234 }
  0xb7   : > { %241 = vst.msk [vmem:[#allocation2 + $0x3] sm:$0xff] %vm240_vm4, %v235_v46 }
  0xbe   : > { %v2188_v49 = vld [vmem:[#allocation2] sm:$0xff]  ;;  %v237_v50 = vpop.permute.xlu0 %236 }
  0xbf   : > { %242 = vst.msk [vmem:[#allocation2 + $0xb] sm:$0xff] %vm240_vm4, %v237_v50  ;;  %v278_v51 = vmul.f32 %v277_v47, %v2188_v49  ;;  %v264_v52 = vmul.f32 %v263_v48, %v2188_v49  ;;  %v320_v60 = vmul.f32 %v319_v58, %v2188_v49  ;;  %v306_v61 = vmul.f32 %v305_v59, %v2188_v49  ;;  %v2215_v3 = vld [vmem:[#allocation2 + $0x1] sm:$0xff] }
  0xc0   : > { %v292_v62 = vmul.f32 %v291_v55, %v2188_v49  ;;  %v370_v6 = vmul.f32 %v369_v4, %v2215_v3  ;;  %v356_v7 = vmul.f32 %v355_v5, %v2215_v3  ;;  %v334_v8 = vmul.f32 %v333_v63, %v2188_v49  ;;  %v2243_v23 = vld [vmem:[#allocation2 + $0x2] sm:$0xff] }
  0xc1   : > { %282 = vrot.lane.b32.xlu0 %v278_v51, %s2023_s14  ;;  %268 = vrot.lane.b32.xlu2 %v264_v52, %s2024_s16  ;;  %v412_v16 = vmul.f32 %v411_v14, %v2215_v3  ;;  %v398_v17 = vmul.f32 %v397_v15, %v2215_v3  ;;  %v384_v18 = vmul.f32 %v383_v10, %v2215_v3  ;;  %v2273_v46 = vld [vmem:[#allocation2 + $0x3] sm:$0xff] }
  0xc2   : > { %v462_v26 = vmul.f32 %v461_v24, %v2243_v23  ;;  %v448_v27 = vmul.f32 %v447_v25, %v2243_v23  ;;  %v426_v28 = vmul.f32 %v425_v19, %v2215_v3  ;;  %v504_v38 = vmul.f32 %v503_v36, %v2243_v23 }
  0xc3   : > { %v490_v39 = vmul.f32 %v489_v37, %v2243_v23  ;;  %v476_v40 = vmul.f32 %v475_v31, %v2243_v23  ;;  %v518_v52 = vmul.f32 %v517_v41, %v2243_v23 }
  0xc6   : > { %v2195_v53 = vld [vmem:[#allocation2 + $0x8] sm:$0xff] }
  0xc7   : > { %v265_v54 = vmul.f32 %v263_v48, %v2195_v53  ;;  %v293_v56 = vmul.f32 %v291_v55, %v2195_v53  ;;  %v279_v57 = vmul.f32 %v277_v47, %v2195_v53  ;;  %v335_v0 = vmul.f32 %v333_v63, %v2195_v53  ;;  %v2223_v9 = vld [vmem:[#allocation2 + $0x9] sm:$0xff] }
  0xc8   : > { %v321_v1 = vmul.f32 %v319_v58, %v2195_v53  ;;  %v307_v2 = vmul.f32 %v305_v59, %v2195_v53  ;;  %v385_v11 = vmul.f32 %v383_v10, %v2223_v9  ;;  %v371_v12 = vmul.f32 %v369_v4, %v2223_v9  ;;  %v2252_v30 = vld [vmem:[#allocation2 + $0xa] sm:$0xff] }
  0xc9   : > { %298 = vrot.lane.b32.xlu0 %v293_v56, %s2025_s24  ;;  %284 = vrot.lane.b32.xlu1 %v279_v57, %s2023_s14  ;;  %v357_v13 = vmul.f32 %v355_v5, %v2223_v9  ;;  %v427_v20 = vmul.f32 %v425_v19, %v2223_v9  ;;  %v413_v21 = vmul.f32 %v411_v14, %v2223_v9  ;;  %v553_v47 = vstv %s1730_s7  ;;  %s2315_s7 = sld [smem:[#allocation3 + $0x7]] }
  0xca   : > { %270 = vrot.lane.b32.xlu2 %v265_v54, %s2024_s16  ;;  %v399_v22 = vmul.f32 %v397_v15, %v2223_v9  ;;  %v477_v32 = vmul.f32 %v475_v31, %v2252_v30  ;;  %v463_v33 = vmul.f32 %v461_v24, %v2252_v30  ;;  %v449_v34 = vmul.f32 %v447_v25, %v2252_v30  ;;  %v2281_v54 = vld [vmem:[#allocation2 + $0xb] sm:$0xff] }
  0xcb   : > { %v519_v42 = vmul.f32 %v517_v41, %v2252_v30  ;;  %v505_v43 = vmul.f32 %v503_v36, %v2252_v30  ;;  %v491_v44 = vmul.f32 %v489_v37, %v2252_v30  ;;  %v539_v48 = vstv %s1729_s20  ;;  %s2324_s20 = sld [smem:[#allocation3 + $0x21]]  ;;  %v2326_v31 = vld [vmem:[#allocation2 + $0xc] sm:$0xff] }
  0xcc   : > { %v554_v50 = vmul.f32 %v553_v47, %v2273_v46  ;;  %v540_v51 = vmul.f32 %v539_v48, %v2273_v46  ;;  %v567_v56 = vstv %s1731_s23  ;;  %v555_v58 = vmul.f32 %v553_v47, %v2281_v54  ;;  %s2329_s23 = sld [smem:[#allocation3 + $0x20]] }
  0xcd   : > { %v569_v57 = vmul.f32 %v567_v56, %v2281_v54  ;;  %v541_v59 = vmul.f32 %v539_v48, %v2281_v54  ;;  %v609_v5 = vstv %s2289_s17  ;;  %s2353_s17 = sld [smem:[#allocation3 + $0x24]] }
  0xce   : > { %v610_v24 = vmul.f32 %v609_v5, %v2273_v46 }
  0xd1   : > { %324 = vrot.lane.b32.xlu0 %v320_v60, %s2026_s26  ;;  %310 = vrot.lane.b32.xlu1 %v306_v61, %s2027_s29  ;;  %v595_v61 = vstv %s1733_s5  ;;  %v687_v48 = vstv %s2324_s20  ;;  %s2341_s5 = sld [smem:[#allocation3 + $0x22]] }
  0xd2   : > { %296 = vrot.lane.b32.xlu2 %v292_v62, %s2025_s24  ;;  %v581_v62 = vstv %s1732_s8  ;;  %v596_v63 = vmul.f32 %v595_v61, %v2273_v46  ;;  %s2350_s8 = sld [smem:[#allocation3 + $0x25]] }
  0xd3   : > { %v583_v10 = vmul.f32 %v581_v62, %v2281_v54  ;;  %s2401_s20 = sld [smem:[#allocation3 + $0x2c]] }
  0xd9   : > { %340 = vrot.lane.b32.xlu0 %v335_v0, %s2028_s3  ;;  %326 = vrot.lane.b32.xlu1 %v321_v1, %s2026_s26  ;;  %v582_v0 = vmul.f32 %v581_v62, %v2273_v46  ;;  %v568_v1 = vmul.f32 %v567_v56, %v2273_v46  ;;  %v689_v62 = vmul.f32 %v687_v48, %v2326_v31 }
  0xda   : > { %312 = vrot.lane.b32.xlu2 %v307_v2, %s2027_s29 }
  0xe1   : > { %374 = vrot.lane.b32.xlu0 %v370_v6, %s2023_s14  ;;  %360 = vrot.lane.b32.xlu1 %v356_v7, %s2024_s16  ;;  %v257_v6 = vstv %s254_s19  ;;  %v611_v7 = vmul.f32 %v609_v5, %v2281_v54  ;;  %v2361_v5 = vld [vmem:[#allocation2 + $0x5] sm:$0xff]  ;;  %s2365_s19 = sld [smem:[#allocation3 + $0x26]] }
  0xe2   : > { %338 = vrot.lane.b32.xlu2 %v334_v8, %s2028_s3  ;;  %v597_v8 = vmul.f32 %v595_v61, %v2281_v54  ;;  %v259_v19 = vmul.f32 %v257_v6, %v2195_v53 }
  0xe9   : > { %390 = vrot.lane.b32.xlu0 %v385_v11, %s2025_s24  ;;  %376 = vrot.lane.b32.xlu1 %v371_v12, %s2023_s14  ;;  %v258_v11 = vmul.f32 %v257_v6, %v2188_v49  ;;  %v737_v6 = vstv %s2350_s8  ;;  %s2418_s8 = sld [smem:[#allocation3 + $0x15]] }
  0xea   : > { %362 = vrot.lane.b32.xlu2 %v357_v13, %s2024_s16 }
  0xf1   : > { %416 = vrot.lane.b32.xlu0 %v412_v16, %s2026_s26  ;;  %402 = vrot.lane.b32.xlu1 %v398_v17, %s2027_s29  ;;  %v2309_v16 = vld [vmem:[#allocation2 + $0x4] sm:$0xff]  ;;  %v645_v17 = vstv %s2297_s25  ;;  %s2367_s25 = sld [smem:[#allocation3 + $0xe]] }
  0xf2   : > { %388 = vrot.lane.b32.xlu2 %v384_v18, %s2025_s24  ;;  %v631_v18 = vstv %s2299_s30  ;;  %v646_v49 = vmul.f32 %v645_v17, %v2309_v16  ;;  %v647_v37 = vmul.f32 %v645_v17, %v2326_v31  ;;  %s2375_s30 = sld [smem:[#allocation3 + $0x28]] }
  0xf9   : > { %432 = vrot.lane.b32.xlu0 %v427_v20, %s2028_s3  ;;  %418 = vrot.lane.b32.xlu1 %v413_v21, %s2026_s26  ;;  %v632_v21 = vmul.f32 %v631_v18, %v2309_v16 }
  0xfa   : > { %404 = vrot.lane.b32.xlu2 %v399_v22, %s2027_s29 }
 0x101   : > { %466 = vrot.lane.b32.xlu0 %v462_v26, %s2023_s14  ;;  %452 = vrot.lane.b32.xlu1 %v448_v27, %s2024_s16 }
 0x102   : > { %430 = vrot.lane.b32.xlu2 %v426_v28, %s2028_s3 }
 0x109   : > { %482 = vrot.lane.b32.xlu0 %v477_v32, %s2025_s24  ;;  %468 = vrot.lane.b32.xlu1 %v463_v33, %s2023_s14  ;;  %v659_v32 = vstv %s2313_s27  ;;  %v349_v33 = vstv %s2315_s7  ;;  %s2380_s27 = sld [smem:[#allocation3 + $0x27]] }
 0x10a   : > { %454 = vrot.lane.b32.xlu2 %v449_v34, %s2024_s16  ;;  %v661_v36 = vmul.f32 %v659_v32, %v2326_v31  ;;  %s2392_s7 = sld [smem:[#allocation3 + $0x29]] }
 0x111   : > { %508 = vrot.lane.b32.xlu0 %v504_v38, %s2026_s26  ;;  %494 = vrot.lane.b32.xlu1 %v490_v39, %s2027_s29  ;;  %v350_v38 = vmul.f32 %v349_v33, %v2215_v3  ;;  %v351_v3 = vmul.f32 %v349_v33, %v2223_v9 }
 0x112   : > { %480 = vrot.lane.b32.xlu2 %v476_v40, %s2025_s24  ;;  %v633_v40 = vmul.f32 %v631_v18, %v2326_v31 }
 0x119   : > { %524 = vrot.lane.b32.xlu0 %v519_v42, %s2028_s3  ;;  %510 = vrot.lane.b32.xlu1 %v505_v43, %s2026_s26 }
 0x11a   : > { %496 = vrot.lane.b32.xlu2 %v491_v44, %s2027_s29 }
 0x11b   : > { %v269_v45 = vpop.permute.xlu2 %268 }
 0x11c   : > { %v274_v14 = vadd.f32 %v269_v45, %v258_v11 }
 0x121   : > { %558 = vrot.lane.b32.xlu0 %v554_v50, %s2023_s14  ;;  %544 = vrot.lane.b32.xlu1 %v540_v51, %s2024_s16  ;;  %v673_v50 = vstv %s2329_s23  ;;  %s2404_s23 = sld [smem:[#allocation3 + $0x2b]] }
 0x122   : > { %522 = vrot.lane.b32.xlu2 %v518_v52, %s2028_s3  ;;  %v688_v52 = vmul.f32 %v687_v48, %v2309_v16 }
 0x124   : > { %v271_v55 = vpop.permute.xlu2 %270 }
 0x125   : > { %v275_v22 = vadd.f32 %v271_v55, %v259_v19  ;;  %v674_v55 = vmul.f32 %v673_v50, %v2309_v16 }
 0x129   : > { %574 = vrot.lane.b32.xlu0 %v569_v57, %s2025_s24  ;;  %560 = vrot.lane.b32.xlu1 %v555_v58, %s2023_s14  ;;  %v660_v57 = vmul.f32 %v659_v32, %v2309_v16 }
 0x12a   : > { %546 = vrot.lane.b32.xlu2 %v541_v59, %s2024_s16 }
 0x12c   : > { %v297_v60 = vpop.permute.xlu2 %296 }
 0x131   : > { %600 = vrot.lane.b32.xlu0 %v596_v63, %s2026_s26  ;;  %586 = vrot.lane.b32.xlu1 %v582_v0, %s2027_s29  ;;  %v675_v63 = vmul.f32 %v673_v50, %v2326_v31 }
 0x132   : > { %572 = vrot.lane.b32.xlu2 %v568_v1, %s2025_s24 }
 0x133   : > { %v283_v2 = vpop.permute.xlu0 %282 }
 0x134   : > { %v313_v4 = vpop.permute.xlu2 %312  ;;  %v288_v20 = vadd.f32 %v283_v2, %v274_v14 }
 0x136   : > { %v302_v25 = vadd.f32 %v297_v60, %v288_v20  ;;  %v701_v60 = vstv %s2341_s5  ;;  %s2416_s5 = sld [smem:[#allocation3 + $0x2d]] }
 0x137   : > { %v703_v61 = vmul.f32 %v701_v60, %v2326_v31 }
 0x139   : > { %616 = vrot.lane.b32.xlu0 %v611_v7, %s2028_s3  ;;  %602 = vrot.lane.b32.xlu1 %v597_v8, %s2026_s26  ;;  %v723_v7 = vstv %s2353_s17  ;;  %s2426_s17 = sld [smem:[#allocation3 + $0x2f]] }
 0x13a   : > { %588 = vrot.lane.b32.xlu2 %v583_v10, %s2027_s29  ;;  %v738_v10 = vmul.f32 %v737_v6, %v2361_v5  ;;  %v724_v11 = vmul.f32 %v723_v7, %v2361_v5 }
 0x13b   : > { %v285_v12 = vpop.permute.xlu1 %284  ;;  %v299_v13 = vpop.permute.xlu0 %298 }
 0x13c   : > { %v339_v15 = vpop.permute.xlu2 %338  ;;  %v289_v26 = vadd.f32 %v285_v12, %v275_v22  ;;  %v441_v22 = vstv %s2367_s25  ;;  %s2443_s25 = sld [smem:[#allocation3 + $0x30]] }
 0x13e   : > { %v303_v34 = vadd.f32 %v299_v13, %v289_v26  ;;  %v702_v13 = vmul.f32 %v701_v60, %v2309_v16 }
 0x140   : > { %v317_v41 = vadd.f32 %v313_v4, %v303_v34 }
 0x141   : > { %650 = vrot.lane.b32.xlu0 %v646_v49, %s2023_s14  ;;  %636 = vrot.lane.b32.xlu1 %v632_v21, %s2024_s16  ;;  %v2377_v49 = vld [vmem:[#allocation2 + $0xd] sm:$0xff]  ;;  %v751_v21 = vstv %s2365_s19  ;;  %s2431_s19 = sld [smem:[#allocation3 + $0x2e]] }
 0x142   : > { %614 = vrot.lane.b32.xlu2 %v610_v24, %s2028_s3  ;;  %v753_v26 = vmul.f32 %v751_v21, %v2377_v49 }
 0x143   : > { %v311_v27 = vpop.permute.xlu1 %310  ;;  %v325_v53 = vpop.permute.xlu0 %324 }
 0x144   : > { %v316_v28 = vadd.f32 %v311_v27, %v302_v25  ;;  %v363_v29 = vpop.permute.xlu2 %362  ;;  %v739_v27 = vmul.f32 %v737_v6, %v2377_v49 }
 0x146   : > { %v330_v35 = vadd.f32 %v325_v53, %v316_v28  ;;  %v442_v53 = vmul.f32 %v441_v22, %v2243_v23  ;;  %v443_v23 = vmul.f32 %v441_v22, %v2252_v30 }
 0x148   : > { %v344_v39 = vadd.f32 %v339_v15, %v330_v35 }
 0x149   : > { %666 = vrot.lane.b32.xlu0 %v661_v36, %s2025_s24  ;;  %652 = vrot.lane.b32.xlu1 %v647_v37, %s2023_s14 }
 0x14a   : > { %v352_v42 = vadd.f32 %v350_v38, %v344_v39  ;;  %638 = vrot.lane.b32.xlu2 %v633_v40, %s2024_s16  ;;  %v779_v38 = vstv %s2375_s30  ;;  %v765_v39 = vstv %s2380_s27  ;;  %s2452_s30 = sld [smem:[#allocation3 + $0x33]] }
 0x14b   : > { %v327_v43 = vpop.permute.xlu1 %326  ;;  %v341_v44 = vpop.permute.xlu0 %340  ;;  %s2455_s27 = sld [smem:[#allocation3 + $0x32]] }
 0x14c   : > { %v331_v45 = vadd.f32 %v327_v43, %v317_v41  ;;  %v389_v47 = vpop.permute.xlu2 %388  ;;  %v780_v41 = vmul.f32 %v779_v38, %v2361_v5 }
 0x14e   : > { %v345_v51 = vadd.f32 %v341_v44, %v331_v45  ;;  %v752_v44 = vmul.f32 %v751_v21, %v2361_v5 }
 0x150   : > { %v353_v56 = vadd.f32 %v351_v3, %v345_v51  ;;  %v793_v3 = vstv %s2392_s7  ;;  %s2467_s7 = sld [smem:[#allocation3 + $0x34]] }
 0x151   : > { %692 = vrot.lane.b32.xlu0 %v688_v52, %s2026_s26  ;;  %678 = vrot.lane.b32.xlu1 %v674_v55, %s2027_s29  ;;  %v795_v52 = vmul.f32 %v793_v3, %v2377_v49  ;;  %v781_v55 = vmul.f32 %v779_v38, %v2377_v49  ;;  %v794_v6 = vmul.f32 %v793_v3, %v2361_v5  ;;  %v921_v3 = vstv %s2452_s30  ;;  %s2520_s30 = sld [smem:[#allocation3 + $0x23]] }
 0x152   : > { %664 = vrot.lane.b32.xlu2 %v660_v57, %s2025_s24  ;;  %v367_v12 = vadd.f32 %v363_v29, %v353_v56  ;;  %v725_v29 = vmul.f32 %v723_v7, %v2377_v49  ;;  %v767_v57 = vmul.f32 %v765_v39, %v2377_v49 }
 0x153   : > { %v361_v58 = vpop.permute.xlu1 %360  ;;  %v375_v59 = vpop.permute.xlu0 %374 }
 0x154   : > { %v405_v9 = vpop.permute.xlu2 %404  ;;  %v366_v0 = vadd.f32 %v361_v58, %v352_v42  ;;  %v766_v42 = vmul.f32 %v765_v39, %v2361_v5 }
 0x156   : > { %v380_v8 = vadd.f32 %v375_v59, %v366_v0 }
 0x158   : > { %v394_v14 = vadd.f32 %v389_v47, %v380_v8 }
 0x159   : > { %708 = vrot.lane.b32.xlu0 %v703_v61, %s2028_s3  ;;  %694 = vrot.lane.b32.xlu1 %v689_v62, %s2026_s26  ;;  %v2412_v61 = vld [vmem:[#allocation2 + $0x6] sm:$0xff]  ;;  %v829_v62 = vstv %s2401_s20  ;;  %s2469_s20 = sld [smem:[#allocation3 + $0x1c]] }
 0x15a   : > { %680 = vrot.lane.b32.xlu2 %v675_v63, %s2027_s29  ;;  %v815_v63 = vstv %s2404_s23  ;;  %s2477_s23 = sld [smem:[#allocation3 + $0x36]] }
 0x15b   : > { %v377_v1 = vpop.permute.xlu1 %376  ;;  %v391_v2 = vpop.permute.xlu0 %390 }
 0x15c   : > { %v431_v4 = vpop.permute.xlu2 %430  ;;  %v381_v15 = vadd.f32 %v377_v1, %v367_v12  ;;  %v830_v1 = vmul.f32 %v829_v62, %v2412_v61  ;;  %v2428_v12 = vld [vmem:[#allocation2 + $0xe] sm:$0xff] }
 0x15d   : > { %v817_v21 = vmul.f32 %v815_v63, %v2428_v12 }
 0x15e   : > { %v395_v24 = vadd.f32 %v391_v2, %v381_v15  ;;  %v816_v2 = vmul.f32 %v815_v63, %v2412_v61  ;;  %v2479_v63 = vld [vmem:[#allocation2 + $0x20] sm:$0xff] }
 0x160   : > { %v409_v32 = vadd.f32 %v405_v9, %v395_v24 }
 0x161   : > { %742 = vrot.lane.b32.xlu0 %v738_v10, %s2023_s14  ;;  %728 = vrot.lane.b32.xlu1 %v724_v11, %s2024_s16 }
 0x162   : > { %706 = vrot.lane.b32.xlu2 %v702_v13, %s2028_s3  ;;  %v843_v13 = vstv %s2416_s5  ;;  %s2482_s5 = sld [smem:[#allocation3 + $0x35]] }
 0x163   : > { %v403_v17 = vpop.permute.xlu1 %402  ;;  %v417_v18 = vpop.permute.xlu0 %416 }
 0x164   : > { %v408_v19 = vadd.f32 %v403_v17, %v394_v14  ;;  %v455_v20 = vpop.permute.xlu2 %454  ;;  %v533_v14 = vstv %s2418_s8  ;;  %v845_v17 = vmul.f32 %v843_v13, %v2428_v12  ;;  %s2494_s8 = sld [smem:[#allocation3 + $0x37]] }
 0x166   : > { %v422_v25 = vadd.f32 %v417_v18, %v408_v19  ;;  %v831_v18 = vmul.f32 %v829_v62, %v2428_v12  ;;  %v534_v19 = vmul.f32 %v533_v14, %v2273_v46  ;;  %v535_v46 = vmul.f32 %v533_v14, %v2281_v54 }
 0x168   : > { %v436_v28 = vadd.f32 %v431_v4, %v422_v25 }
 0x169   : > { %758 = vrot.lane.b32.xlu0 %v753_v26, %s2025_s24  ;;  %744 = vrot.lane.b32.xlu1 %v739_v27, %s2023_s14 }
 0x16a   : > { %v444_v33 = vadd.f32 %v442_v53, %v436_v28  ;;  %730 = vrot.lane.b32.xlu2 %v725_v29, %s2024_s16  ;;  %v871_v53 = vstv %s2426_s17  ;;  %v857_v28 = vstv %s2431_s19  ;;  %s2503_s17 = sld [smem:[#allocation3 + $0x3a]] }
 0x16b   : > { %v419_v34 = vpop.permute.xlu1 %418  ;;  %v433_v35 = vpop.permute.xlu0 %432  ;;  %s2506_s19 = sld [smem:[#allocation3 + $0x39]] }
 0x16c   : > { %v423_v36 = vadd.f32 %v419_v34, %v409_v32  ;;  %v481_v37 = vpop.permute.xlu2 %480  ;;  %v872_v32 = vmul.f32 %v871_v53, %v2412_v61 }
 0x16e   : > { %v437_v40 = vadd.f32 %v433_v35, %v423_v36  ;;  %v844_v35 = vmul.f32 %v843_v13, %v2412_v61 }
 0x170   : > { %v445_v43 = vadd.f32 %v443_v23, %v437_v40  ;;  %v885_v23 = vstv %s2443_s25  ;;  %s2518_s25 = sld [smem:[#allocation3 + $0x3b]] }
 0x171   : > { %784 = vrot.lane.b32.xlu0 %v780_v41, %s2026_s26  ;;  %770 = vrot.lane.b32.xlu1 %v766_v42, %s2027_s29  ;;  %v887_v41 = vmul.f32 %v885_v23, %v2428_v12  ;;  %v873_v42 = vmul.f32 %v871_v53, %v2428_v12 }
 0x172   : > { %v459_v45 = vadd.f32 %v455_v20, %v445_v43  ;;  %756 = vrot.lane.b32.xlu2 %v752_v44, %s2025_s24  ;;  %v859_v44 = vmul.f32 %v857_v28, %v2428_v12 }
 0x173   : > { %v453_v47 = vpop.permute.xlu1 %452  ;;  %v467_v48 = vpop.permute.xlu0 %466 }
 0x174   : > { %v458_v30 = vadd.f32 %v453_v47, %v444_v33  ;;  %v497_v50 = vpop.permute.xlu2 %496  ;;  %v858_v33 = vmul.f32 %v857_v28, %v2412_v61 }
 0x176   : > { %v472_v51 = vadd.f32 %v467_v48, %v458_v30 }
 0x178   : > { %v486_v56 = vadd.f32 %v481_v37, %v472_v51  ;;  %v907_v51 = vstv %s2455_s27  ;;  %s2528_s27 = sld [smem:[#allocation3 + $0x3d]] }
 0x179   : > { %800 = vrot.lane.b32.xlu0 %v795_v52, %s2028_s3  ;;  %786 = vrot.lane.b32.xlu1 %v781_v55, %s2026_s26 }
 0x17a   : > { %772 = vrot.lane.b32.xlu2 %v767_v57, %s2027_s29 }
 0x17b   : > { %v469_v58 = vpop.permute.xlu1 %468  ;;  %v483_v59 = vpop.permute.xlu0 %482 }
 0x17c   : > { %v473_v9 = vadd.f32 %v469_v58, %v459_v45  ;;  %v523_v60 = vpop.permute.xlu2 %522  ;;  %v886_v58 = vmul.f32 %v885_v23, %v2412_v61  ;;  %v1013_v23 = vstv %s2503_s17  ;;  %s2571_s17 = sld [smem:[#allocation3 + $0x2a]] }
 0x17e   : > { %v487_v0 = vadd.f32 %v483_v59, %v473_v9 }
 0x180   : > { %v501_v4 = vadd.f32 %v497_v50, %v487_v0  ;;  %v2463_v50 = vld [vmem:[#allocation2 + $0x18] sm:$0xff]  ;;  %v935_v0 = vstv %s2467_s7  ;;  %s2533_s7 = sld [smem:[#allocation3 + $0x3c]] }
 0x181   : > { %834 = vrot.lane.b32.xlu0 %v830_v1, %s2023_s14  ;;  %820 = vrot.lane.b32.xlu1 %v816_v2, %s2024_s16  ;;  %v922_v55 = vmul.f32 %v921_v3, %v2463_v50  ;;  %v625_v1 = vstv %s2469_s20  ;;  %s2545_s20 = sld [smem:[#allocation3 + $0x3e]] }
 0x182   : > { %798 = vrot.lane.b32.xlu2 %v794_v6, %s2028_s3  ;;  %v923_v6 = vmul.f32 %v921_v3, %v2479_v63 }
 0x183   : > { %v495_v7 = vpop.permute.xlu1 %494  ;;  %v509_v8 = vpop.permute.xlu0 %508 }
 0x184   : > { %v500_v10 = vadd.f32 %v495_v7, %v486_v56  ;;  %v547_v11 = vpop.permute.xlu2 %546  ;;  %v908_v56 = vmul.f32 %v907_v51, %v2463_v50  ;;  %v626_v7 = vmul.f32 %v625_v1, %v2309_v16  ;;  %v627_v16 = vmul.f32 %v625_v1, %v2326_v31 }
 0x186   : > { %v514_v15 = vadd.f32 %v509_v8, %v500_v10  ;;  %v909_v10 = vmul.f32 %v907_v51, %v2479_v63  ;;  %v2530_v51 = vld [vmem:[#allocation2 + $0x21] sm:$0xff] }
 0x188   : > { %v528_v20 = vadd.f32 %v523_v60, %v514_v15 }
 0x189   : > { %850 = vrot.lane.b32.xlu0 %v845_v17, %s2025_s24  ;;  %836 = vrot.lane.b32.xlu1 %v831_v18, %s2023_s14  ;;  %v963_v18 = vstv %s2477_s23  ;;  %s2554_s23 = sld [smem:[#allocation3 + $0x41]] }
 0x18a   : > { %v536_v22 = vadd.f32 %v534_v19, %v528_v20  ;;  %822 = vrot.lane.b32.xlu2 %v817_v21, %s2024_s16  ;;  %v949_v19 = vstv %s2482_s5  ;;  %v964_v21 = vmul.f32 %v963_v18, %v2463_v50  ;;  %s2557_s5 = sld [smem:[#allocation3 + $0x40]] }
 0x18b   : > { %v511_v24 = vpop.permute.xlu1 %510  ;;  %v525_v25 = vpop.permute.xlu0 %524 }
 0x18c   : > { %v515_v26 = vadd.f32 %v511_v24, %v501_v4  ;;  %v573_v27 = vpop.permute.xlu2 %572  ;;  %v937_v4 = vmul.f32 %v935_v0, %v2479_v63 }
 0x18e   : > { %v529_v29 = vadd.f32 %v525_v25, %v515_v26  ;;  %v936_v25 = vmul.f32 %v935_v0, %v2463_v50 }
 0x190   : > { %v537_v34 = vadd.f32 %v535_v46, %v529_v29  ;;  %v977_v46 = vstv %s2494_s8  ;;  %s2569_s8 = sld [smem:[#allocation3 + $0x42]] }
 0x191   : > { %876 = vrot.lane.b32.xlu0 %v872_v32, %s2026_s26  ;;  %862 = vrot.lane.b32.xlu1 %v858_v33, %s2027_s29  ;;  %v979_v32 = vmul.f32 %v977_v46, %v2479_v63  ;;  %v965_v33 = vmul.f32 %v963_v18, %v2479_v63 }
 0x192   : > { %v551_v36 = vadd.f32 %v547_v11, %v537_v34  ;;  %848 = vrot.lane.b32.xlu2 %v844_v35, %s2025_s24  ;;  %v951_v35 = vmul.f32 %v949_v19, %v2479_v63 }
 0x193   : > { %v545_v37 = vpop.permute.xlu1 %544  ;;  %v559_v38 = vpop.permute.xlu0 %558 }
 0x194   : > { %v550_v54 = vadd.f32 %v545_v37, %v536_v22  ;;  %v589_v39 = vpop.permute.xlu2 %588  ;;  %v950_v22 = vmul.f32 %v949_v19, %v2463_v50 }
 0x196   : > { %v564_v40 = vadd.f32 %v559_v38, %v550_v54 }
 0x198   : > { %v578_v43 = vadd.f32 %v573_v27, %v564_v40  ;;  %v999_v40 = vstv %s2506_s19  ;;  %s2579_s19 = sld [smem:[#allocation3 + $0x44]] }
 0x199   : > { %892 = vrot.lane.b32.xlu0 %v887_v41, %s2028_s3  ;;  %878 = vrot.lane.b32.xlu1 %v873_v42, %s2026_s26 }
 0x19a   : > { %864 = vrot.lane.b32.xlu2 %v859_v44, %s2027_s29 }
 0x19b   : > { %v561_v45 = vpop.permute.xlu1 %560  ;;  %v575_v47 = vpop.permute.xlu0 %574 }
 0x19c   : > { %v565_v48 = vadd.f32 %v561_v45, %v551_v36  ;;  %v615_v30 = vpop.permute.xlu2 %614  ;;  %v978_v45 = vmul.f32 %v977_v46, %v2463_v50  ;;  %v1105_v46 = vstv %s2554_s23  ;;  %s2622_s23 = sld [smem:[#allocation3 + $0x49]] }
 0x19e   : > { %v579_v52 = vadd.f32 %v575_v47, %v565_v48 }
 0x1a0   : > { %v593_v57 = vadd.f32 %v589_v39, %v579_v52  ;;  %v2514_v39 = vld [vmem:[#allocation2 + $0x19] sm:$0xff]  ;;  %v1027_v52 = vstv %s2518_s25  ;;  %s2584_s25 = sld [smem:[#allocation3 + $0x43]] }
 0x1a1   : > { %926 = vrot.lane.b32.xlu0 %v922_v55, %s2023_s14  ;;  %912 = vrot.lane.b32.xlu1 %v908_v56, %s2024_s16  ;;  %v1014_v42 = vmul.f32 %v1013_v23, %v2514_v39  ;;  %v717_v55 = vstv %s2520_s30  ;;  %s2596_s30 = sld [smem:[#allocation3 + $0x45]] }
 0x1a2   : > { %890 = vrot.lane.b32.xlu2 %v886_v58, %s2028_s3  ;;  %v1015_v58 = vmul.f32 %v1013_v23, %v2530_v51 }
 0x1a3   : > { %v587_v59 = vpop.permute.xlu1 %586  ;;  %v601_v9 = vpop.permute.xlu0 %600 }
 0x1a4   : > { %v592_v60 = vadd.f32 %v587_v59, %v578_v43  ;;  %v639_v62 = vpop.permute.xlu2 %638  ;;  %v1000_v43 = vmul.f32 %v999_v40, %v2514_v39  ;;  %v718_v59 = vmul.f32 %v717_v55, %v2361_v5  ;;  %v719_v5 = vmul.f32 %v717_v55, %v2377_v49 }
 0x1a6   : > { %v606_v2 = vadd.f32 %v601_v9, %v592_v60  ;;  %v1001_v60 = vmul.f32 %v999_v40, %v2530_v51  ;;  %v2581_v40 = vld [vmem:[#allocation2 + $0x22] sm:$0xff] }
 0x1a8   : > { %v620_v8 = vadd.f32 %v615_v30, %v606_v2 }
 0x1a9   : > { %942 = vrot.lane.b32.xlu0 %v937_v4, %s2025_s24  ;;  %928 = vrot.lane.b32.xlu1 %v923_v6, %s2023_s14  ;;  %v1055_v6 = vstv %s2528_s27  ;;  %s2605_s27 = sld [smem:[#allocation3 + $0x48]] }
 0x1aa   : > { %v628_v11 = vadd.f32 %v626_v7, %v620_v8  ;;  %914 = vrot.lane.b32.xlu2 %v909_v10, %s2024_s16  ;;  %v1041_v7 = vstv %s2533_s7  ;;  %v1056_v10 = vmul.f32 %v1055_v6, %v2514_v39  ;;  %s2608_s7 = sld [smem:[#allocation3 + $0x47]] }
 0x1ab   : > { %v603_v13 = vpop.permute.xlu1 %602  ;;  %v617_v14 = vpop.permute.xlu0 %616 }
 0x1ac   : > { %v607_v15 = vadd.f32 %v603_v13, %v593_v57  ;;  %v665_v17 = vpop.permute.xlu2 %664  ;;  %v1029_v57 = vmul.f32 %v1027_v52, %v2530_v51 }
 0x1ae   : > { %v621_v20 = vadd.f32 %v617_v14, %v607_v15  ;;  %v1028_v14 = vmul.f32 %v1027_v52, %v2514_v39 }
 0x1b0   : > { %v629_v24 = vadd.f32 %v627_v16, %v621_v20  ;;  %v1069_v16 = vstv %s2545_s20  ;;  %s2620_s20 = sld [smem:[#allocation3 + $0x31]] }
 0x1b1   : > { %968 = vrot.lane.b32.xlu0 %v964_v21, %s2026_s26  ;;  %954 = vrot.lane.b32.xlu1 %v950_v22, %s2027_s29  ;;  %v1071_v21 = vmul.f32 %v1069_v16, %v2530_v51  ;;  %v1057_v22 = vmul.f32 %v1055_v6, %v2530_v51 }
 0x1b2   : > { %v643_v26 = vadd.f32 %v639_v62, %v629_v24  ;;  %940 = vrot.lane.b32.xlu2 %v936_v25, %s2025_s24  ;;  %v1043_v25 = vmul.f32 %v1041_v7, %v2530_v51 }
 0x1b3   : > { %v637_v27 = vpop.permute.xlu1 %636  ;;  %v651_v53 = vpop.permute.xlu0 %650 }
 0x1b4   : > { %v642_v31 = vadd.f32 %v637_v27, %v628_v11  ;;  %v681_v28 = vpop.permute.xlu2 %680  ;;  %v1042_v11 = vmul.f32 %v1041_v7, %v2514_v39 }
 0x1b6   : > { %v656_v29 = vadd.f32 %v651_v53, %v642_v31 }
 0x1b8   : > { %v670_v34 = vadd.f32 %v665_v17, %v656_v29  ;;  %v1091_v29 = vstv %s2557_s5  ;;  %s2630_s5 = sld [smem:[#allocation3 + $0x4b]] }
 0x1b9   : > { %984 = vrot.lane.b32.xlu0 %v979_v32, %s2028_s3  ;;  %970 = vrot.lane.b32.xlu1 %v965_v33, %s2026_s26 }
 0x1ba   : > { %956 = vrot.lane.b32.xlu2 %v951_v35, %s2027_s29 }
 0x1bb   : > { %v653_v36 = vpop.permute.xlu1 %652  ;;  %v667_v37 = vpop.permute.xlu0 %666 }
 0x1bc   : > { %v657_v38 = vadd.f32 %v653_v36, %v643_v26  ;;  %v707_v54 = vpop.permute.xlu2 %706  ;;  %v1070_v36 = vmul.f32 %v1069_v16, %v2514_v39  ;;  %v1197_v16 = vstv %s2605_s27  ;;  %s2673_s27 = sld [smem:[#allocation3 + $0x50]] }
 0x1be   : > { %v671_v41 = vadd.f32 %v667_v37, %v657_v38 }
 0x1c0   : > { %v685_v44 = vadd.f32 %v681_v28, %v671_v41  ;;  %v2565_v28 = vld [vmem:[#allocation2 + $0x1a] sm:$0xff]  ;;  %v1119_v41 = vstv %s2569_s8  ;;  %s2634_s8 = sld [smem:[#allocation3 + $0x4a]] }
 0x1c1   : > { %1018 = vrot.lane.b32.xlu0 %v1014_v42, %s2023_s14  ;;  %1004 = vrot.lane.b32.xlu1 %v1000_v43, %s2024_s16  ;;  %v1106_v33 = vmul.f32 %v1105_v46, %v2565_v28  ;;  %v809_v42 = vstv %s2571_s17  ;;  %s2648_s17 = sld [smem:[#allocation3 + $0x4c]] }
 0x1c2   : > { %982 = vrot.lane.b32.xlu2 %v978_v45, %s2028_s3  ;;  %v1107_v45 = vmul.f32 %v1105_v46, %v2581_v40 }
 0x1c3   : > { %v679_v47 = vpop.permute.xlu1 %678  ;;  %v693_v48 = vpop.permute.xlu0 %692 }
 0x1c4   : > { %v684_v30 = vadd.f32 %v679_v47, %v670_v34  ;;  %v731_v3 = vpop.permute.xlu2 %730  ;;  %v1092_v34 = vmul.f32 %v1091_v29, %v2565_v28  ;;  %v810_v47 = vmul.f32 %v809_v42, %v2412_v61  ;;  %v811_v61 = vmul.f32 %v809_v42, %v2428_v12 }
 0x1c6   : > { %v698_v56 = vadd.f32 %v693_v48, %v684_v30  ;;  %v1093_v30 = vmul.f32 %v1091_v29, %v2581_v40  ;;  %v2632_v29 = vld [vmem:[#allocation2 + $0x23] sm:$0xff] }
 0x1c8   : > { %v712_v9 = vadd.f32 %v707_v54, %v698_v56 }
 0x1c9   : > { %1034 = vrot.lane.b32.xlu0 %v1029_v57, %s2025_s24  ;;  %1020 = vrot.lane.b32.xlu1 %v1015_v58, %s2023_s14  ;;  %v1147_v58 = vstv %s2579_s19  ;;  %s2656_s19 = sld [smem:[#allocation3 + $0x4f]] }
 0x1ca   : > { %v720_v62 = vadd.f32 %v718_v59, %v712_v9  ;;  %1006 = vrot.lane.b32.xlu2 %v1001_v60, %s2024_s16  ;;  %v1133_v59 = vstv %s2584_s25  ;;  %v1148_v60 = vmul.f32 %v1147_v58, %v2565_v28  ;;  %s2658_s25 = sld [smem:[#allocation3 + $0x4e]] }
 0x1cb   : > { %v695_v0 = vpop.permute.xlu1 %694  ;;  %v709_v1 = vpop.permute.xlu0 %708 }
 0x1cc   : > { %v699_v2 = vadd.f32 %v695_v0, %v685_v44  ;;  %v757_v4 = vpop.permute.xlu2 %756  ;;  %v1121_v44 = vmul.f32 %v1119_v41, %v2581_v40 }
 0x1ce   : > { %v713_v8 = vadd.f32 %v709_v1, %v699_v2  ;;  %v1120_v1 = vmul.f32 %v1119_v41, %v2565_v28 }
 0x1d0   : > { %v721_v13 = vadd.f32 %v719_v5, %v713_v8  ;;  %v1161_v5 = vstv %s2596_s30  ;;  %s2671_s30 = sld [smem:[#allocation3 + $0x38]] }
 0x1d1   : > { %1060 = vrot.lane.b32.xlu0 %v1056_v10, %s2026_s26  ;;  %1046 = vrot.lane.b32.xlu1 %v1042_v11, %s2027_s29  ;;  %v1163_v10 = vmul.f32 %v1161_v5, %v2581_v40  ;;  %v1149_v11 = vmul.f32 %v1147_v58, %v2581_v40 }
 0x1d2   : > { %v735_v15 = vadd.f32 %v731_v3, %v721_v13  ;;  %1032 = vrot.lane.b32.xlu2 %v1028_v14, %s2025_s24  ;;  %v1135_v14 = vmul.f32 %v1133_v59, %v2581_v40 }
 0x1d3   : > { %v729_v17 = vpop.permute.xlu1 %728  ;;  %v743_v18 = vpop.permute.xlu0 %742 }
 0x1d4   : > { %v734_v49 = vadd.f32 %v729_v17, %v720_v62  ;;  %v773_v19 = vpop.permute.xlu2 %772  ;;  %v1134_v62 = vmul.f32 %v1133_v59, %v2565_v28 }
 0x1d6   : > { %v748_v20 = vadd.f32 %v743_v18, %v734_v49 }
 0x1d8   : > { %v762_v24 = vadd.f32 %v757_v4, %v748_v20  ;;  %v1183_v20 = vstv %s2608_s7  ;;  %s2681_s7 = sld [smem:[#allocation3 + $0x52]] }
 0x1d9   : > { %1076 = vrot.lane.b32.xlu0 %v1071_v21, %s2028_s3  ;;  %1062 = vrot.lane.b32.xlu1 %v1057_v22, %s2026_s26 }
 0x1da   : > { %1048 = vrot.lane.b32.xlu2 %v1043_v25, %s2027_s29 }
 0x1db   : > { %v745_v26 = vpop.permute.xlu1 %744  ;;  %v759_v27 = vpop.permute.xlu0 %758 }
 0x1dc   : > { %v749_v53 = vadd.f32 %v745_v26, %v735_v15  ;;  %v799_v31 = vpop.permute.xlu2 %798  ;;  %v1162_v26 = vmul.f32 %v1161_v5, %v2565_v28  ;;  %v1289_v5 = vstv %s2656_s19  ;;  %s2724_s19 = sld [smem:[#allocation3 + $0x57]] }
 0x1de   : > { %v763_v32 = vadd.f32 %v759_v27, %v749_v53 }
 0x1e0   : > { %v777_v35 = vadd.f32 %v773_v19, %v763_v32  ;;  %v2616_v19 = vld [vmem:[#allocation2 + $0x1b] sm:$0xff]  ;;  %v901_v32 = vstv %s2620_s20  ;;  %s2685_s20 = sld [smem:[#allocation3 + $0x51]] }
 0x1e1   : > { %1110 = vrot.lane.b32.xlu0 %v1106_v33, %s2023_s14  ;;  %1096 = vrot.lane.b32.xlu1 %v1092_v34, %s2024_s16  ;;  %v1198_v22 = vmul.f32 %v1197_v16, %v2616_v19  ;;  %v1211_v34 = vstv %s2622_s23  ;;  %s2699_s23 = sld [smem:[#allocation3 + $0x53]] }
 0x1e2   : > { %1074 = vrot.lane.b32.xlu2 %v1070_v36, %s2028_s3  ;;  %v1199_v36 = vmul.f32 %v1197_v16, %v2632_v29 }
 0x1e3   : > { %v771_v37 = vpop.permute.xlu1 %770  ;;  %v785_v38 = vpop.permute.xlu0 %784 }
 0x1e4   : > { %v776_v54 = vadd.f32 %v771_v37, %v762_v24  ;;  %v823_v23 = vpop.permute.xlu2 %822  ;;  %v1184_v24 = vmul.f32 %v1183_v20, %v2616_v19 }
 0x1e6   : > { %v790_v43 = vadd.f32 %v785_v38, %v776_v54  ;;  %v1185_v38 = vmul.f32 %v1183_v20, %v2632_v29  ;;  %v902_v54 = vmul.f32 %v901_v32, %v2463_v50  ;;  %v2683_v20 = vld [vmem:[#allocation2 + $0x24] sm:$0xff] }
 0x1e8   : > { %v804_v48 = vadd.f32 %v799_v31, %v790_v43 }
 0x1e9   : > { %1126 = vrot.lane.b32.xlu0 %v1121_v44, %s2025_s24  ;;  %1112 = vrot.lane.b32.xlu1 %v1107_v45, %s2023_s14  ;;  %v1239_v45 = vstv %s2630_s5  ;;  %s2707_s5 = sld [smem:[#allocation3 + $0x56]] }
 0x1ea   : > { %v812_v3 = vadd.f32 %v810_v47, %v804_v48  ;;  %1098 = vrot.lane.b32.xlu2 %v1093_v30, %s2024_s16  ;;  %v1225_v47 = vstv %s2634_s8  ;;  %v903_v48 = vmul.f32 %v901_v32, %v2479_v63  ;;  %v1240_v50 = vmul.f32 %v1239_v45, %v2616_v19  ;;  %s2709_s8 = sld [smem:[#allocation3 + $0x55]] }
 0x1eb   : > { %v787_v52 = vpop.permute.xlu1 %786  ;;  %v801_v55 = vpop.permute.xlu0 %800 }
 0x1ec   : > { %v791_v56 = vadd.f32 %v787_v52, %v777_v35  ;;  %v849_v57 = vpop.permute.xlu2 %848  ;;  %v1213_v35 = vmul.f32 %v1211_v34, %v2632_v29 }
 0x1ee   : > { %v805_v9 = vadd.f32 %v801_v55, %v791_v56  ;;  %v1212_v55 = vmul.f32 %v1211_v34, %v2616_v19 }
 0x1f0   : > { %v813_v0 = vadd.f32 %v811_v61, %v805_v9  ;;  %v1253_v9 = vstv %s2648_s17  ;;  %s2722_s17 = sld [smem:[#allocation3 + $0x3f]] }
 0x1f1   : > { %1152 = vrot.lane.b32.xlu0 %v1148_v60, %s2026_s26  ;;  %1138 = vrot.lane.b32.xlu1 %v1134_v62, %s2027_s29  ;;  %v1255_v60 = vmul.f32 %v1253_v9, %v2632_v29  ;;  %v1241_v62 = vmul.f32 %v1239_v45, %v2632_v29 }
 0x1f2   : > { %v827_v2 = vadd.f32 %v823_v23, %v813_v0  ;;  %1124 = vrot.lane.b32.xlu2 %v1120_v1, %s2025_s24  ;;  %v1227_v0 = vmul.f32 %v1225_v47, %v2632_v29 }
 0x1f3   : > { %v821_v4 = vpop.permute.xlu1 %820  ;;  %v835_v6 = vpop.permute.xlu0 %834 }
 0x1f4   : > { %v826_v12 = vadd.f32 %v821_v4, %v812_v3  ;;  %v865_v7 = vpop.permute.xlu2 %864  ;;  %v1226_v3 = vmul.f32 %v1225_v47, %v2616_v19 }
 0x1f6   : > { %v840_v8 = vadd.f32 %v835_v6, %v826_v12 }
 0x1f8   : > { %v854_v13 = vadd.f32 %v849_v57, %v840_v8  ;;  %v1275_v8 = vstv %s2658_s25  ;;  %s2732_s25 = sld [smem:[#allocation3 + $0x58]] }
 0x1f9   : > { %1168 = vrot.lane.b32.xlu0 %v1163_v10, %s2028_s3  ;;  %1154 = vrot.lane.b32.xlu1 %v1149_v11, %s2026_s26 }
 0x1fa   : > { %1140 = vrot.lane.b32.xlu2 %v1135_v14, %s2027_s29  ;;  %v1254_v14 = vmul.f32 %v1253_v9, %v2616_v19  ;;  %v1367_v9 = vstv %s2709_s8  ;;  %s2783_s8 = sld [smem:[#allocation3 + $0x5f]] }
 0x1fb   : > { %v837_v15 = vpop.permute.xlu1 %836  ;;  %v851_v17 = vpop.permute.xlu0 %850 }
 0x1fc   : > { %v841_v18 = vadd.f32 %v837_v15, %v827_v2  ;;  %v891_v49 = vpop.permute.xlu2 %890 }
 0x1fe   : > { %v855_v21 = vadd.f32 %v851_v17, %v841_v18 }
 0x200   : > { %v869_v25 = vadd.f32 %v865_v7, %v855_v21  ;;  %v2667_v7 = vld [vmem:[#allocation2 + $0x1c] sm:$0xff]  ;;  %v993_v21 = vstv %s2671_s30  ;;  %s2736_s30 = sld [smem:[#allocation3 + $0x59]] }
 0x201   : > { %1202 = vrot.lane.b32.xlu0 %v1198_v22, %s2023_s14  ;;  %1188 = vrot.lane.b32.xlu1 %v1184_v24, %s2024_s16  ;;  %v1290_v11 = vmul.f32 %v1289_v5, %v2667_v7  ;;  %v1303_v24 = vstv %s2673_s27  ;;  %s2750_s27 = sld [smem:[#allocation3 + $0x5a]] }
 0x202   : > { %1166 = vrot.lane.b32.xlu2 %v1162_v26, %s2028_s3  ;;  %v1291_v26 = vmul.f32 %v1289_v5, %v2683_v20 }
 0x203   : > { %v863_v27 = vpop.permute.xlu1 %862  ;;  %v877_v53 = vpop.permute.xlu0 %876 }
 0x204   : > { %v868_v31 = vadd.f32 %v863_v27, %v854_v13  ;;  %v915_v46 = vpop.permute.xlu2 %914  ;;  %v1276_v13 = vmul.f32 %v1275_v8, %v2667_v7 }
 0x206   : > { %v882_v33 = vadd.f32 %v877_v53, %v868_v31  ;;  %v1277_v53 = vmul.f32 %v1275_v8, %v2683_v20  ;;  %v994_v31 = vmul.f32 %v993_v21, %v2514_v39  ;;  %v2734_v8 = vld [vmem:[#allocation2 + $0x25] sm:$0xff] }
 0x208   : > { %v896_v37 = vadd.f32 %v891_v49, %v882_v33 }
 0x209   : > { %1218 = vrot.lane.b32.xlu0 %v1213_v35, %s2025_s24  ;;  %1204 = vrot.lane.b32.xlu1 %v1199_v36, %s2023_s14  ;;  %v1331_v36 = vstv %s2681_s7  ;;  %s2758_s7 = sld [smem:[#allocation3 + $0x5c]] }
 0x20a   : > { %1190 = vrot.lane.b32.xlu2 %v1185_v38, %s2024_s16  ;;  %v904_v23 = vadd.f32 %v902_v54, %v896_v37  ;;  %v1317_v37 = vstv %s2685_s20  ;;  %v995_v38 = vmul.f32 %v993_v21, %v2530_v51  ;;  %v1332_v39 = vmul.f32 %v1331_v36, %v2667_v7  ;;  %s2760_s20 = sld [smem:[#allocation3 + $0x5d]] }
 0x20b   : > { %v879_v41 = vpop.permute.xlu1 %878  ;;  %v893_v42 = vpop.permute.xlu0 %892 }
 0x20c   : > { %v883_v43 = vadd.f32 %v879_v41, %v869_v25  ;;  %v941_v44 = vpop.permute.xlu2 %940  ;;  %v1305_v25 = vmul.f32 %v1303_v24, %v2683_v20 }
 0x20e   : > { %v897_v30 = vadd.f32 %v893_v42, %v883_v43  ;;  %v1304_v42 = vmul.f32 %v1303_v24, %v2667_v7 }
 0x210   : > { %v905_v52 = vadd.f32 %v903_v48, %v897_v30  ;;  %v1345_v30 = vstv %s2699_s23  ;;  %s2773_s23 = sld [smem:[#allocation3 + $0x46]] }
 0x211   : > { %1244 = vrot.lane.b32.xlu0 %v1240_v50, %s2026_s26  ;;  %1230 = vrot.lane.b32.xlu1 %v1226_v3, %s2027_s29  ;;  %v1347_v50 = vmul.f32 %v1345_v30, %v2683_v20  ;;  %v1333_v3 = vmul.f32 %v1331_v36, %v2683_v20 }
 0x212   : > { %1216 = vrot.lane.b32.xlu2 %v1212_v55, %s2025_s24  ;;  %v919_v56 = vadd.f32 %v915_v46, %v905_v52  ;;  %v1319_v52 = vmul.f32 %v1317_v37, %v2683_v20 }
 0x213   : > { %v913_v57 = vpop.permute.xlu1 %912  ;;  %v927_v63 = vpop.permute.xlu0 %926 }
 0x214   : > { %v918_v58 = vadd.f32 %v913_v57, %v904_v23  ;;  %v957_v59 = vpop.permute.xlu2 %956  ;;  %v1318_v23 = vmul.f32 %v1317_v37, %v2667_v7 }
 0x216   : > { %v932_v61 = vadd.f32 %v927_v63, %v918_v58 }
 0x218   : > { %v946_v1 = vadd.f32 %v941_v44, %v932_v61  ;;  %v1381_v61 = vstv %s2707_s5  ;;  %s2775_s5 = sld [smem:[#allocation3 + $0x5e]] }
 0x219   : > { %1260 = vrot.lane.b32.xlu0 %v1255_v60, %s2028_s3  ;;  %1246 = vrot.lane.b32.xlu1 %v1241_v62, %s2026_s26 }
 0x21a   : > { %1232 = vrot.lane.b32.xlu2 %v1227_v0, %s2027_s29 }
 0x21b   : > { %v929_v2 = vpop.permute.xlu1 %928  ;;  %v943_v4 = vpop.permute.xlu0 %942 }
 0x21c   : > { %v933_v6 = vadd.f32 %v929_v2, %v919_v56  ;;  %v983_v12 = vpop.permute.xlu2 %982 }
 0x21e   : > { %v947_v10 = vadd.f32 %v943_v4, %v933_v6 }
 0x220   : > { %v961_v15 = vadd.f32 %v957_v59, %v947_v10  ;;  %v2718_v59 = vld [vmem:[#allocation2 + $0x1d] sm:$0xff]  ;;  %v1085_v10 = vstv %s2722_s17  ;;  %s2787_s17 = sld [smem:[#allocation3 + $0x60]] }
 0x221   : > { %1294 = vrot.lane.b32.xlu0 %v1290_v11, %s2023_s14  ;;  %1280 = vrot.lane.b32.xlu1 %v1276_v13, %s2024_s16  ;;  %v1382_v62 = vmul.f32 %v1381_v61, %v2718_v59  ;;  %v1368_v0 = vmul.f32 %v1367_v9, %v2718_v59  ;;  %v1395_v13 = vstv %s2724_s19  ;;  %s1804_s19 = sld [smem:[#allocation3 + $0x61]] }
 0x222   : > { %1258 = vrot.lane.b32.xlu2 %v1254_v14, %s2028_s3  ;;  %v1383_v14 = vmul.f32 %v1381_v61, %v2734_v8 }
 0x223   : > { %v955_v17 = vpop.permute.xlu1 %954  ;;  %v969_v18 = vpop.permute.xlu0 %968 }
 0x224   : > { %v960_v49 = vadd.f32 %v955_v17, %v946_v1  ;;  %v1007_v16 = vpop.permute.xlu2 %1006  ;;  %v1346_v1 = vmul.f32 %v1345_v30, %v2667_v7  ;;  %v1473_v30 = vstv %s2760_s20 }
 0x226   : > { %v974_v22 = vadd.f32 %v969_v18, %v960_v49  ;;  %v1369_v18 = vmul.f32 %v1367_v9, %v2734_v8  ;;  %v1086_v49 = vmul.f32 %v1085_v10, %v2565_v28  ;;  %v2785_v9 = vld [vmem:[#allocation2 + $0x26] sm:$0xff] }
 0x228   : > { %v988_v27 = vadd.f32 %v983_v12, %v974_v22 }
 0x229   : > { %1310 = vrot.lane.b32.xlu0 %v1305_v25, %s2025_s24  ;;  %1296 = vrot.lane.b32.xlu1 %v1291_v26, %s2023_s14  ;;  %v1409_v26 = vstv %s2732_s25 }
 0x22a   : > { %1282 = vrot.lane.b32.xlu2 %v1277_v53, %s2024_s16  ;;  %v996_v46 = vadd.f32 %v994_v31, %v988_v27  ;;  %v1423_v27 = vstv %s2736_s30  ;;  %v1087_v53 = vmul.f32 %v1085_v10, %v2581_v40  ;;  %v1410_v28 = vmul.f32 %v1409_v26, %v2718_v59 }
 0x22b   : > { %v971_v32 = vpop.permute.xlu1 %970  ;;  %v985_v33 = vpop.permute.xlu0 %984 }
 0x22c   : > { %v975_v34 = vadd.f32 %v971_v32, %v961_v15  ;;  %v1033_v35 = vpop.permute.xlu2 %1032  ;;  %v1397_v15 = vmul.f32 %v1395_v13, %v2734_v8 }
 0x22e   : > { %v989_v54 = vadd.f32 %v985_v33, %v975_v34  ;;  %v1396_v33 = vmul.f32 %v1395_v13, %v2718_v59 }
 0x230   : > { %v997_v41 = vadd.f32 %v995_v38, %v989_v54  ;;  %v1437_v54 = vstv %s2750_s27  ;;  %s1597_s27 = scalar_lea.sflag [#allocation5], %s2147_s4 }
 0x231   : > { %1336 = vrot.lane.b32.xlu0 %v1332_v39, %s2026_s26  ;;  %1322 = vrot.lane.b32.xlu1 %v1318_v23, %s2027_s29  ;;  %v1425_v39 = vmul.f32 %v1423_v27, %v2734_v8  ;;  %v1439_v23 = vmul.f32 %v1437_v54, %v2734_v8 }
 0x232   : > { %1308 = vrot.lane.b32.xlu2 %v1304_v42, %s2025_s24  ;;  %v1011_v43 = vadd.f32 %v1007_v16, %v997_v41  ;;  %v1411_v41 = vmul.f32 %v1409_v26, %v2734_v8 }
 0x233   : > { %v1005_v44 = vpop.permute.xlu1 %1004  ;;  %v1019_v51 = vpop.permute.xlu0 %1018 }
 0x234   : > { %v1010_v45 = vadd.f32 %v1005_v44, %v996_v46  ;;  %v1049_v47 = vpop.permute.xlu2 %1048  ;;  %v1424_v46 = vmul.f32 %v1423_v27, %v2718_v59 }
 0x236   : > { %v1024_v48 = vadd.f32 %v1019_v51, %v1010_v45 }
 0x238   : > { %v1038_v55 = vadd.f32 %v1033_v35, %v1024_v48  ;;  %v1459_v48 = vstv %s2758_s7 }
 0x239   : > { %1352 = vrot.lane.b32.xlu0 %v1347_v50, %s2028_s3  ;;  %1338 = vrot.lane.b32.xlu1 %v1333_v3, %s2026_s26 }
 0x23a   : > { %1324 = vrot.lane.b32.xlu2 %v1319_v52, %s2027_s29 }
 0x23b   : > { %v1021_v56 = vpop.permute.xlu1 %1020  ;;  %v1035_v57 = vpop.permute.xlu0 %1034 }
 0x23c   : > { %v1025_v63 = vadd.f32 %v1021_v56, %v1011_v43  ;;  %v1075_v58 = vpop.permute.xlu2 %1074 }
 0x23e   : > { %v1039_v60 = vadd.f32 %v1035_v57, %v1025_v63 }
 0x240   : > { %v1053_v2 = vadd.f32 %v1049_v47, %v1039_v60  ;;  %v2769_v47 = vld [vmem:[#allocation2 + $0x1e] sm:$0xff]  ;;  %v1177_v60 = vstv %s2773_s23 }
 0x241   : > { %1386 = vrot.lane.b32.xlu0 %v1382_v62, %s2023_s14  ;;  %1372 = vrot.lane.b32.xlu1 %v1368_v0, %s2024_s16  ;;  %v1460_v3 = vmul.f32 %v1459_v48, %v2769_v47  ;;  %v1474_v52 = vmul.f32 %v1473_v30, %v2769_v47  ;;  %v1487_v0 = vstv %s2775_s5  ;;  %s1965_s5 = scalar_lea.hbm %s2874_s2, 128 }
 0x242   : > { %1350 = vrot.lane.b32.xlu2 %v1346_v1, %s2028_s3  ;;  %v1475_v1 = vmul.f32 %v1473_v30, %v2785_v9 }
 0x243   : > { %v1047_v4 = vpop.permute.xlu1 %1046  ;;  %v1061_v6 = vpop.permute.xlu0 %1060 }
 0x244   : > { %v1052_v12 = vadd.f32 %v1047_v4, %v1038_v55  ;;  %v1099_v5 = vpop.permute.xlu2 %1098  ;;  %v1438_v55 = vmul.f32 %v1437_v54, %v2718_v59 }
 0x246   : > { %v1066_v11 = vadd.f32 %v1061_v6, %v1052_v12  ;;  %v1461_v6 = vmul.f32 %v1459_v48, %v2785_v9  ;;  %v1178_v12 = vmul.f32 %v1177_v60, %v2616_v19 }
 0x248   : > { %v1080_v17 = vadd.f32 %v1075_v58, %v1066_v11 }
 0x249   : > { %1388 = vrot.lane.b32.xlu1 %v1383_v14, %s2023_s14  ;;  %1402 = vrot.lane.b32.xlu0 %v1397_v15, %s2025_s24  ;;  %v1501_v15 = vstv %s2783_s8 }
 0x24a   : > { %1374 = vrot.lane.b32.xlu2 %v1369_v18, %s2024_s16  ;;  %v1088_v16 = vadd.f32 %v1086_v49, %v1080_v17  ;;  %v1515_v17 = vstv %s2787_s17  ;;  %v1179_v18 = vmul.f32 %v1177_v60, %v2632_v29 }
 0x24b   : > { %v1063_v21 = vpop.permute.xlu1 %1062  ;;  %v1077_v22 = vpop.permute.xlu0 %1076  ;;  %v1516_v19 = vmul.f32 %v1515_v17, %v2769_v47 }
 0x24c   : > { %v1067_v24 = vadd.f32 %v1063_v21, %v1053_v2  ;;  %v1125_v25 = vpop.permute.xlu2 %1124  ;;  %v1489_v2 = vmul.f32 %v1487_v0, %v2785_v9 }
 0x24e   : > { %v1081_v31 = vadd.f32 %v1077_v22, %v1067_v24  ;;  %v1488_v22 = vmul.f32 %v1487_v0, %v2769_v47 }
 0x250   : > { %v1089_v32 = vadd.f32 %v1087_v53, %v1081_v31  ;;  %v1529_v31 = vstv %s1804_s19 }
 0x251   : > { %1414 = vrot.lane.b32.xlu1 %v1410_v28, %s2027_s29  ;;  %1428 = vrot.lane.b32.xlu0 %v1424_v46, %s2026_s26  ;;  %v1517_v28 = vmul.f32 %v1515_v17, %v2785_v9  ;;  %v1531_v46 = vmul.f32 %v1529_v31, %v2785_v9 }
 0x252   : > { %1400 = vrot.lane.b32.xlu2 %v1396_v33, %s2025_s24  ;;  %v1103_v34 = vadd.f32 %v1099_v5, %v1089_v32  ;;  %v1503_v32 = vmul.f32 %v1501_v15, %v2785_v9 }
 0x253   : > { %v1097_v35 = vpop.permute.xlu1 %1096  ;;  %v1111_v40 = vpop.permute.xlu0 %1110 }
 0x254   : > { %v1102_v36 = vadd.f32 %v1097_v35, %v1088_v16  ;;  %v1141_v37 = vpop.permute.xlu2 %1140  ;;  %v1502_v16 = vmul.f32 %v1501_v15, %v2769_v47 }
 0x256   : > { %v1116_v38 = vadd.f32 %v1111_v40, %v1102_v36 }
 0x258   : > { %v1130_v42 = vadd.f32 %v1125_v25, %v1116_v38  ;;  %v1530_v38 = vmul.f32 %v1529_v31, %v2769_v47 }
 0x259   : > { %1430 = vrot.lane.b32.xlu1 %v1425_v39, %s2026_s26  ;;  %1444 = vrot.lane.b32.xlu0 %v1439_v23, %s2028_s3 }
 0x25a   : > { %1416 = vrot.lane.b32.xlu2 %v1411_v41, %s2027_s29 }
 0x25b   : > { %v1113_v43 = vpop.permute.xlu1 %1112  ;;  %v1127_v44 = vpop.permute.xlu0 %1126 }
 0x25c   : > { %v1117_v51 = vadd.f32 %v1113_v43, %v1103_v34  ;;  %v1167_v45 = vpop.permute.xlu2 %1166 }
 0x25e   : > { %v1131_v50 = vadd.f32 %v1127_v44, %v1117_v51 }
 0x260   : > { %v1145_v56 = vadd.f32 %v1141_v37, %v1131_v50 }
 0x261   : > { %1464 = vrot.lane.b32.xlu1 %v1460_v3, %s2024_s16  ;;  %1478 = vrot.lane.b32.xlu0 %v1474_v52, %s2023_s14 }
 0x262   : > { %1442 = vrot.lane.b32.xlu2 %v1438_v55, %s2028_s3 }
 0x263   : > { %v1139_v57 = vpop.permute.xlu1 %1138  ;;  %v1153_v63 = vpop.permute.xlu0 %1152 }
 0x264   : > { %v1144_v58 = vadd.f32 %v1139_v57, %v1130_v42  ;;  %v1191_v61 = vpop.permute.xlu2 %1190 }
 0x266   : > { %v1158_v62 = vadd.f32 %v1153_v63, %v1144_v58 }
 0x268   : > { %v1172_v4 = vadd.f32 %v1167_v45, %v1158_v62 }
 0x269   : > { %1480 = vrot.lane.b32.xlu1 %v1475_v1, %s2023_s14  ;;  %1494 = vrot.lane.b32.xlu0 %v1489_v2, %s2025_s24  ;;  %s1784_s14 = sld [smem:[#allocation3 + $0x4d]] }
 0x26a   : > { %1466 = vrot.lane.b32.xlu2 %v1461_v6, %s2024_s16  ;;  %v1180_v5 = vadd.f32 %v1178_v12, %v1172_v4  ;;  %s1791_s16 = sld [smem:[#allocation3 + $0x54]] }
 0x26b   : > { %v1155_v10 = vpop.permute.xlu1 %1154  ;;  %v1169_v11 = vpop.permute.xlu0 %1168 }
 0x26c   : > { %v1159_v13 = vadd.f32 %v1155_v10, %v1145_v56  ;;  %v1217_v14 = vpop.permute.xlu2 %1216 }
 0x26e   : > { %v1173_v49 = vadd.f32 %v1169_v11, %v1159_v13 }
 0x26f   : > { %v1269_v43 = vstv %s1784_s14 }
 0x270   : > { %v1181_v21 = vadd.f32 %v1179_v18, %v1173_v49  ;;  %v1270_v45 = vmul.f32 %v1269_v43, %v2667_v7  ;;  %v1271_v55 = vmul.f32 %v1269_v43, %v2683_v20  ;;  %v1361_v13 = vstv %s1791_s16 }
 0x271   : > { %1506 = vrot.lane.b32.xlu1 %v1502_v16, %s2027_s29  ;;  %1520 = vrot.lane.b32.xlu0 %v1516_v19, %s2026_s26  ;;  %v1362_v17 = vmul.f32 %v1361_v13, %v2718_v59 }
 0x272   : > { %1492 = vrot.lane.b32.xlu2 %v1488_v22, %s2025_s24  ;;  %v1195_v24 = vadd.f32 %v1191_v61, %v1181_v21  ;;  %s1798_s24 = sld [smem:[#allocation3 + $0x5b]] }
 0x273   : > { %v1189_v25 = vpop.permute.xlu1 %1188  ;;  %v1203_v26 = vpop.permute.xlu0 %1202 }
 0x274   : > { %v1194_v27 = vadd.f32 %v1189_v25, %v1180_v5  ;;  %v1233_v29 = vpop.permute.xlu2 %1232 }
 0x276   : > { %v1208_v53 = vadd.f32 %v1203_v26, %v1194_v27 }
 0x278   : > { %v1222_v33 = vadd.f32 %v1217_v14, %v1208_v53 }
 0x279   : > { %1522 = vrot.lane.b32.xlu1 %v1517_v28, %s2026_s26  ;;  %1536 = vrot.lane.b32.xlu0 %v1531_v46, %s2028_s3  ;;  %s1811_s26 = sshll.u32 %s2067_s13, 6 }
 0x27a   : > { %1508 = vrot.lane.b32.xlu2 %v1503_v32, %s2027_s29  ;;  %s177_s29 = scalar_lea.vmem [#allocation8], %s1706_s6  ;;  %s1608_s13 = scalar_lea.hbm %s2874_s2, %s1811_s26 }
 0x27b   : > { %v1205_v34 = vpop.permute.xlu1 %1204  ;;  %v1219_v35 = vpop.permute.xlu0 %1218  ;;  %s1609_s6 = sshll.u32 %s177_s29, 4  ;;  %s1611_s30 = sshll.u32 %s1608_s13, 4  ;;  %s1610_s6 = int_to_ptr.vmem [resolvable:$true] %s1609_s6  ;;  %s1612_s30 = int_to_ptr.hbm [resolvable:$true] %s1611_s30 }
 0x27c   : > { %v1209_v40 = vadd.f32 %v1205_v34, %v1195_v24  ;;  %v1259_v36 = vpop.permute.xlu2 %1258  ;;  %v1363_v24 = vmul.f32 %v1361_v13, %v2734_v8  ;;  %s1959_s7 = sshra.s32 %s1612_s30, 4  ;;  %s1960_s7 = int_to_ptr.hbm [resolvable:$true] %s1959_s7 }
 0x27d   : > { %s1961_s20 = scalar_lea.hbm %s1960_s7, 64  ;;  %p1966_p0 = scmp.lt.s32.totalorder %s1960_s7, %s2874_s2 }
 0x27e   : > { %v1223_v37 = vadd.f32 %v1219_v35, %v1209_v40  ;;  %p1962_p4 = scmp.ne.s32.totalorder %s1960_s7, %s1961_s20  ;;  %p1967_p3 = scmp.lt.s32.totalorder %s1965_s5, %s1961_s20 }
 0x280   : > { %v1237_v54 = vadd.f32 %v1233_v29, %v1223_v37  ;;  %p1963_p6 = pnand %p1962_p4, %p2098_p11  ;;  %p1968_p5 = por %p1967_p3, %p1966_p0 }
 0x282   : > { %1534 = vrot.lane.b32.xlu2 %v1530_v38, %s2028_s3  ;;  %v1453_v38 = vstv %s1798_s24  ;;  %p1964_p13 = pneg %p1963_p6 }
 0x283   : > { %v1231_v39 = vpop.permute.xlu1 %1230  ;;  %v1245_v23 = vpop.permute.xlu0 %1244 }
 0x284   : > { %v1236_v41 = vadd.f32 %v1231_v39, %v1222_v33  ;;  %v1283_v42 = vpop.permute.xlu2 %1282  ;;  %p1969_p8 = pnand %p1968_p5, %p1964_p13 }
 0x286   : > { %v1250_v44 = vadd.f32 %v1245_v23, %v1236_v41  ;;  %v1454_v41 = vmul.f32 %v1453_v38, %v2769_v47 }
 0x288   : > { %v1264_v51 = vadd.f32 %v1259_v36, %v1250_v44 }
 0x28a   : > { %v1272_v48 = vadd.f32 %v1270_v45, %v1264_v51 }
 0x28b   : > { %v1247_v30 = vpop.permute.xlu1 %1246  ;;  %v1261_v50 = vpop.permute.xlu0 %1260 }
 0x28c   : > { %v1251_v3 = vadd.f32 %v1247_v30, %v1237_v54  ;;  %v1309_v52 = vpop.permute.xlu2 %1308 }
 0x28e   : > { %v1265_v56 = vadd.f32 %v1261_v50, %v1251_v3 }
 0x290   : > { %v1273_v57 = vadd.f32 %v1271_v55, %v1265_v56 }
 0x292   : > { %v1287_v4 = vadd.f32 %v1283_v42, %v1273_v57 }
 0x293   : > { %v1281_v63 = vpop.permute.xlu1 %1280  ;;  %v1295_v58 = vpop.permute.xlu0 %1294 }
 0x294   : > { %v1325_v61 = vpop.permute.xlu2 %1324  ;;  %v1286_v60 = vadd.f32 %v1281_v63, %v1272_v48  ;;  %v1455_v48 = vmul.f32 %v1453_v38, %v2785_v9 }
 0x296   : > { %v1300_v2 = vadd.f32 %v1295_v58, %v1286_v60 }
 0x298   : > { %v1314_v6 = vadd.f32 %v1309_v52, %v1300_v2 }
 0x29b   : > { %v1297_v62 = vpop.permute.xlu1 %1296  ;;  %v1311_v0 = vpop.permute.xlu0 %1310 }
 0x29c   : > { %v1351_v1 = vpop.permute.xlu2 %1350  ;;  %v1301_v7 = vadd.f32 %v1297_v62, %v1287_v4 }
 0x29e   : > { %v1315_v20 = vadd.f32 %v1311_v0, %v1301_v7 }
 0x2a0   : > { %v1329_v18 = vadd.f32 %v1325_v61, %v1315_v20 }
 0x2a3   : > { %v1323_v12 = vpop.permute.xlu1 %1322  ;;  %v1337_v5 = vpop.permute.xlu0 %1336 }
 0x2a4   : > { %v1328_v10 = vadd.f32 %v1323_v12, %v1314_v6  ;;  %v1375_v11 = vpop.permute.xlu2 %1374 }
 0x2a6   : > { %v1342_v14 = vadd.f32 %v1337_v5, %v1328_v10 }
 0x2a8   : > { %v1356_v15 = vadd.f32 %v1351_v1, %v1342_v14 }
 0x2aa   : > { %v1364_v49 = vadd.f32 %v1362_v17, %v1356_v15 }
 0x2ab   : > { %v1339_v16 = vpop.permute.xlu1 %1338  ;;  %v1353_v19 = vpop.permute.xlu0 %1352 }
 0x2ac   : > { %v1343_v21 = vadd.f32 %v1339_v16, %v1329_v18  ;;  %v1401_v22 = vpop.permute.xlu2 %1400 }
 0x2ae   : > { %v1357_v25 = vadd.f32 %v1353_v19, %v1343_v21 }
 0x2b0   : > { %v1365_v26 = vadd.f32 %v1363_v24, %v1357_v25 }
 0x2b2   : > { %v1379_v59 = vadd.f32 %v1375_v11, %v1365_v26 }
 0x2b3   : > { %v1373_v27 = vpop.permute.xlu1 %1372  ;;  %v1387_v29 = vpop.permute.xlu0 %1386 }
 0x2b4   : > { %v1417_v53 = vpop.permute.xlu2 %1416  ;;  %v1378_v31 = vadd.f32 %v1373_v27, %v1364_v49 }
 0x2b6   : > { %v1392_v32 = vadd.f32 %v1387_v29, %v1378_v31 }
 0x2b8   : > { %v1406_v35 = vadd.f32 %v1401_v22, %v1392_v32 }
 0x2bb   : > { %v1389_v28 = vpop.permute.xlu1 %1388  ;;  %v1403_v46 = vpop.permute.xlu0 %1402 }
 0x2bc   : > { %v1443_v33 = vpop.permute.xlu2 %1442  ;;  %v1393_v34 = vadd.f32 %v1389_v28, %v1379_v59  ;;  %v1892_v59 = vld [vmem:[%s2153_s28] sm:$0xff] }
 0x2be   : > { %v1407_v54 = vadd.f32 %v1403_v46, %v1393_v34 }
 0x2c0   : > { %v1421_v42 = vadd.f32 %v1417_v53, %v1407_v54  ;;  %v1895_v54 = vld [vmem:[%s2153_s28 + $0x30] sm:$0xff] }
 0x2c3   : > { %v1415_v40 = vpop.permute.xlu1 %1414  ;;  %v1429_v36 = vpop.permute.xlu0 %1428 }
 0x2c4   : > { %v1420_v37 = vadd.f32 %v1415_v40, %v1406_v35  ;;  %v1467_v39 = vpop.permute.xlu2 %1466  ;;  %v1893_v35 = vld [vmem:[%s2153_s28 + $0x10] sm:$0xff] }
 0x2c6   : > { %v1434_v8 = vadd.f32 %v1429_v36, %v1420_v37  ;;  %v1894_v36 = vld [vmem:[%s2153_s28 + $0x20] sm:$0xff] }
 0x2c8   : > { %v1448_v23 = vadd.f32 %v1443_v33, %v1434_v8 }
 0x2ca   : > { %v1456_v43 = vadd.f32 %v1454_v41, %v1448_v23 }
 0x2cb   : > { %v1431_v44 = vpop.permute.xlu1 %1430  ;;  %v1445_v51 = vpop.permute.xlu0 %1444 }
 0x2cc   : > { %v1435_v45 = vadd.f32 %v1431_v44, %v1421_v42  ;;  %v1493_v3 = vpop.permute.xlu2 %1492 }
 0x2ce   : > { %v1449_v30 = vadd.f32 %v1445_v51, %v1435_v45  ;;  %v1896_v51 = vld [vmem:[%s2153_s28 + $0x8] sm:$0xff] }
 0x2d0   : > { %v1457_v50 = vadd.f32 %v1455_v48, %v1449_v30  ;;  %v1897_v48 = vld [vmem:[%s2153_s28 + $0x18] sm:$0xff] }
 0x2d2   : > { %v1471_v60 = vadd.f32 %v1467_v39, %v1457_v50  ;;  %v1898_v50 = vld [vmem:[%s2153_s28 + $0x28] sm:$0xff] }
 0x2d3   : > { %v1465_v52 = vpop.permute.xlu1 %1464  ;;  %v1479_v55 = vpop.permute.xlu0 %1478 }
 0x2d4   : > { %v1470_v56 = vadd.f32 %v1465_v52, %v1456_v43  ;;  %v1509_v58 = vpop.permute.xlu2 %1508  ;;  %v1899_v52 = vld [vmem:[%s2153_s28 + $0x38] sm:$0xff] }
 0x2d6   : > { %v1484_v61 = vadd.f32 %v1479_v55, %v1470_v56 }
 0x2d8   : > { %v1498_v47 = vadd.f32 %v1493_v3, %v1484_v61 }
 0x2db   : > { %v1481_v57 = vpop.permute.xlu1 %1480  ;;  %v1495_v63 = vpop.permute.xlu0 %1494 }
 0x2dc   : > { %v1485_v62 = vadd.f32 %v1481_v57, %v1471_v60  ;;  %v1535_v6 = vpop.permute.xlu2 %1534 }
 0x2de   : > { %v1499_v4 = vadd.f32 %v1495_v63, %v1485_v62 }
 0x2e0   : > { %v1513_v5 = vadd.f32 %v1509_v58, %v1499_v4 }
 0x2e3   : > { %v1507_v0 = vpop.permute.xlu1 %1506  ;;  %v1521_v1 = vpop.permute.xlu0 %1520 }
 0x2e4   : > { %v1512_v2 = vadd.f32 %v1507_v0, %v1498_v47 }
 0x2e6   : > { %v1526_v7 = vadd.f32 %v1521_v1, %v1512_v2 }
 0x2e8   : > { %v1540_v9 = vadd.f32 %v1535_v6, %v1526_v7 }
 0x2ea   : > { %v1542_v12 = vsub.f32 0.0, %v1540_v9 }
 0x2eb   : > { %v1523_v10 = vpop.permute.xlu1 %1522  ;;  %v1537_v20 = vpop.permute.xlu0 %1536 }
 0x2ec   : > { %v1544_v11 = vmul.f32 1.442695, %v1542_v12  ;;  %v1527_v13 = vadd.f32 %v1523_v10, %v1513_v5 }
 0x2ee   : > { %1884 = vpow2.f32 %v1544_v11  ;;  %v1541_v14 = vadd.f32 %v1537_v20, %v1527_v13 }
 0x2f0   : > { %v1543_v15 = vsub.f32 0.0, %v1541_v14 }
 0x2f2   : > { %v1546_v17 = vmul.f32 1.442695, %v1543_v15 }
 0x2f4   : > { %v1885_v18 = vpop.eup %1884  ;;  %1886 = vpow2.f32 %v1546_v17 }
 0x2f5   : > { %v1548_v49 = vadd.f32 1.0, %v1885_v18 }
 0x2f7   : > { %1888 = vrcp.f32 %v1548_v49  ;;  %v1561_v25 = vand.u32 2147483648, %v1548_v49  ;;  %v1559_v27 = vand.u32 2147483647, %v1548_v49  ;;  %vm1555_vm6 = vweird.f32 %v1548_v49 }
 0x2f9   : > { %v1562_v28 = vor.u32 1.1754944e-38, %v1561_v25  ;;  %vm1560_vm8 = vcmp.eq.f32.partialorder %v1559_v27, 8.507059e+37 }
 0x2fa   : > { %v1887_v16 = vpop.eup %1886 }
 0x2fb   : > { %v1549_v19 = vadd.f32 1.0, %v1887_v16 }
 0x2fd   : > { %v1889_v21 = vpop.eup %1888  ;;  %1890 = vrcp.f32 %v1549_v19  ;;  %v1576_v38 = vand.u32 2147483648, %v1549_v19  ;;  %v1574_v23 = vand.u32 2147483647, %v1549_v19  ;;  %vm1570_vm10 = vweird.f32 %v1549_v19 }
 0x2fe   : > { %v1551_v22 = vmul.f32 %v1889_v21, %v1548_v49  ;;  %vm1556_vm5 = vweird.f32 %v1889_v21 }
 0x2ff   : > { %vm1557_vm7 = vmor %vm1555_vm6, %vm1556_vm5  ;;  %v1577_v42 = vor.u32 1.1754944e-38, %v1576_v38  ;;  %vm1575_vm12 = vcmp.eq.f32.partialorder %v1574_v23, 8.507059e+37 }
 0x300   : > { %v1552_v24 = vsub.f32 1.0, %v1551_v22 }
 0x302   : > { %v1553_v26 = vmul.f32 %v1889_v21, %v1552_v24 }
 0x303   : > { %v1891_v29 = vpop.eup %1890 }
 0x304   : > { %v1554_v53 = vadd.f32 %v1889_v21, %v1553_v26  ;;  %v1566_v31 = vmul.f32 %v1891_v29, %v1549_v19  ;;  %vm1571_vm9 = vweird.f32 %v1891_v29 }
 0x305   : > { %vm1572_vm11 = vmor %vm1570_vm10, %vm1571_vm9 }
 0x306   : > { %v1558_v46 = vsel %vm1557_vm7, %v1889_v21, %v1554_v53  ;;  %v1567_v32 = vsub.f32 1.0, %v1566_v31 }
 0x307   : > { %v1563_v33 = vsel %vm1560_vm8, %v1562_v28, %v1558_v46 }
 0x308   : > { %v1580_v34 = vmul.f32 %v1892_v59, %v1563_v33  ;;  %v1582_v40 = vmul.f32 %v1893_v35, %v1563_v33  ;;  %v1584_v37 = vmul.f32 %v1894_v36, %v1563_v33  ;;  %v1586_v8 = vmul.f32 %v1895_v54, %v1563_v33 }
 0x309   : > { %v1568_v39 = vmul.f32 %v1891_v29, %v1567_v32 }
 0x30a   : > { %1588 = vst.msk [vmem:[%s177_s29] sm:$0xff] %vm186_vm0, %v1580_v34 }
 0x30b   : > { %1590 = vst.msk [vmem:[%s177_s29 + $0x10] sm:$0xff] %vm186_vm0, %v1582_v40  ;;  %v1569_v41 = vadd.f32 %v1891_v29, %v1568_v39 }
 0x30c   : > { %1592 = vst.msk [vmem:[%s177_s29 + $0x20] sm:$0xff] %vm186_vm0, %v1584_v37 }
 0x30d   : > { %1594 = vst.msk [vmem:[%s177_s29 + $0x30] sm:$0xff] %vm186_vm0, %v1586_v8  ;;  %v1573_v43 = vsel %vm1572_vm11, %v1891_v29, %v1569_v41 }
 0x30e   : > { %v1578_v44 = vsel %vm1575_vm12, %v1577_v42, %v1573_v43 }
 0x30f   : > { %v1581_v45 = vmul.f32 %v1896_v51, %v1578_v44  ;;  %v1583_v30 = vmul.f32 %v1897_v48, %v1578_v44  ;;  %v1585_v3 = vmul.f32 %v1898_v50, %v1578_v44  ;;  %v1587_v55 = vmul.f32 %v1899_v52, %v1578_v44 }
 0x311   : > { %1589 = vst.msk [vmem:[%s177_s29 + $0x8] sm:$0xff] %vm186_vm0, %v1581_v45 }
 0x312   : > { %1591 = vst.msk [vmem:[%s177_s29 + $0x18] sm:$0xff] %vm186_vm0, %v1583_v30 }
 0x313   : > { %1593 = vst.msk [vmem:[%s177_s29 + $0x28] sm:$0xff] %vm186_vm0, %v1585_v3 }
 0x314   : > { %1595 = vst.msk [vmem:[%s177_s29 + $0x38] sm:$0xff] %vm186_vm0, %v1587_v55 }
 0x315   : > { %1972 = shalt.err (!%p1969_p8)
}
 0x316   : > { %s2029_s4 = smov 128   ;;  %s2030_s19 = smov 8  }
 0x317   : > { %1818 = dma.vmem_to_hbm [thread:$0]  (%p2098_p11), %s1610_s6, 1024, %s1612_s30, %s1597_s27, %s2029_s4, %s2029_s4, %s2030_s19  }
 0x318 PF: > { %s1626_s14 = sand.u32 1, %s2003_s9   ;;  %p2881_p9 = scmp.ge.s32.totalorder %s2015_s12, 2 }
 0x319   : > { %s1627_s16 = scalar_lea.sflag [#allocation5], %s1626_s14 }
 0x31a   : > { %p1829_p10 = pnand %p2881_p9, %p2102_p12 }
 0x31c   : > { %p1830_p1 = pneg %p1829_p10 }
 0x31e   : > { %1998 = dma.done.wait (%p1830_p1), %s1627_s16, 1024  }
 0x31f   : > { %2000 = vsyncadd (%p1830_p1), %s1627_s16, 4294966272  ;;  %p16_p2 = scmp.ge.s32.totalorder %s2071_s15, 4   ;;  %s2882_s9 = smov %s2007_s10 }
 0x320   : > { %s2883_s10 = smov %s2011_s11  ;;  %s2884_s11 = smov %s2083_s18 }
 0x321   : > { %s2885_s12 = smov %s2071_s15  ;;  %18 = sbr.rel (!%p16_p2) target bundleno = 6 (0x6), region = 79 }
 0x326   :  { %1633 = vsyncpa [#allocation4], 1 }
 0x327   :  { %1635 = vsyncpa [#allocation4 + $0x1], 1 }
 0x328   :  { %1636 = vsyncpa [#allocation5], 1 }
 0x329   :  { %1638 = vsyncpa [#allocation5 + $0x1], 1 }
 0x32a   :  { %1639 = vsyncpa [#allocation6], 1 }
 0x32b   :  { %1641 = vsyncpa [#allocation6 + $0x1], 1 }

</bundles_post_ra>
